<compile_context>
chip_gen: v6e
topology: v6e:2x2x1
jax: 0.10.0
libtpu: 0.0.40
codegen_flags: <defaults>
</compile_context>

<pallas_src>
import functools
import numpy as np
import jax
import jax.numpy as jnp
from jax.experimental import pallas as pl
from jax.experimental.pallas import tpu as pltpu

KSIZE = 7
PAD = 3


# -------- Stage 1: channel mean / max, lane-dense -----------------------------

def _channel_reduce_single_kernel(x_ref, o_ref, *, C):
    # x_ref: (1, C, HW) input tile; o_ref: (1, 2, HW) f32 output [avg, max].
    x = x_ref[0].astype(jnp.float32)
    o_ref[0, 0:1, :] = jnp.sum(x, axis=0, keepdims=True) * jnp.float32(1.0 / C)
    o_ref[0, 1:2, :] = jnp.max(x, axis=0, keepdims=True)


def _channel_reduce_kernel(x_ref, o_ref, sum_ref, max_ref, *, C, C_blk):
    # x_ref:   (1, C_blk, HW) input tile
    # o_ref:   (1, 2, HW) f32 output [avg, max] (written once, at last C step)
    # sum_ref/max_ref: (1, HW) f32 running accumulators (persist across c axis)
    c = pl.program_id(1)

    @pl.when(c == 0)
    def _init():
        sum_ref[...] = jnp.zeros_like(sum_ref)
        max_ref[...] = jnp.full_like(max_ref, -jnp.inf)

    x = x_ref[0].astype(jnp.float32)                 # cast per C-chunk only
    if C % C_blk != 0:
        # Last block may extend past C: mask out-of-range channels.
        ch = jax.lax.broadcasted_iota(jnp.int32, x.shape, 0) + c * C_blk
        valid = ch < C
        x_sum = jnp.where(valid, x, 0.0)
        x_max = jnp.where(valid, x, -jnp.inf)
    else:
        x_sum = x
        x_max = x

    sum_ref[...] += jnp.sum(x_sum, axis=0, keepdims=True)
    max_ref[...] = jnp.maximum(max_ref[...],
                               jnp.max(x_max, axis=0, keepdims=True))

    @pl.when(c == pl.num_programs(1) - 1)
    def _finalize():
        o_ref[0, 0:1, :] = sum_ref[...] * jnp.float32(1.0 / C)
        o_ref[0, 1:2, :] = max_ref[...]


# -------- Stage 2: 7x7 conv (as banded matmuls) + sigmoid ----------------------

def _conv_sigmoid_kernel(maps_ref, band_ref, o_ref, pad_ref, *, H, W):
    # maps_ref: (1, 2, H, W) f32 [avg, max]
    # band_ref: (2, KSIZE, W, W) f32 banded weight matrices (carry the kw taps
    #           and the horizontal zero padding)
    # o_ref:    (1, 1, H, W)
    # pad_ref:  VMEM scratch (2, H + 2*PAD, W) f32 (vertical padding only)
    zhalo = jnp.zeros((PAD, W), jnp.float32)
    for p in range(2):
        pad_ref[p, :PAD, :] = zhalo                   # zero only the halo rows
        pad_ref[p, PAD + H:, :] = zhalo
        pad_ref[p, PAD:PAD + H, :] = maps_ref[0, p]   # interior overwritten

    acc = jnp.zeros((H, W), jnp.float32)
    for p in range(2):
        for kh in range(KSIZE):
            # (H, W) row block (sublane-offset read) x (W, W) band on the MXU.
            acc = acc + jnp.dot(pad_ref[p, kh:kh + H, :], band_ref[p, kh],
                                preferred_element_type=jnp.float32,
                                precision=jax.lax.Precision.HIGHEST)
    o_ref[0, 0] = jax.nn.sigmoid(acc).astype(o_ref.dtype)


def _build_band(conv_weight, W):
    # band[p, kh, j, w] = weight[0, p, kh, j - w + PAD] when that tap exists,
    # else 0.  Then conv(out)[h, w] = sum_{p,kh,j} vpad_p[kh+h, j] * band[...].
    wt = conv_weight.reshape(2, KSIZE, KSIZE).astype(jnp.float32)
    j = jnp.arange(W)[:, None]
    w = jnp.arange(W)[None, :]
    kw = j - w + PAD
    valid = (kw >= 0) & (kw < KSIZE)
    band = jnp.where(valid[None, None], wt[:, :, jnp.clip(kw, 0, KSIZE - 1)], 0.0)
    return band                                       # (2, KSIZE, W, W) f32


# -------- Wrapper --------------------------------------------------------------

def _choose_c_block(C, HW, itemsize, target_bytes=4 * 1024 * 1024):
    if C * HW * itemsize <= target_bytes:
        return int(C)
    blk = max(8, (target_bytes // (HW * itemsize)) // 8 * 8)
    return int(min(blk, C))


def spatial_attention(x, conv_weight):
    """x: (N, C, H, W); conv_weight: (1, 2, 7, 7) as nn.Conv2d(2,1,7,padding=3,bias=False)."""
    N, C, H, W = x.shape
    HW = H * W
    x_flat = x.reshape(N, C, HW)                      # free: NCHW is contiguous
    c_blk = _choose_c_block(C, HW, x.dtype.itemsize)
    n_cblk = pl.cdiv(C, c_blk)

    x_tile_bytes = c_blk * HW * x.dtype.itemsize
    vmem_limit = int(min(64 * 1024 * 1024,
                         max(16 * 1024 * 1024,
                             2 * x_tile_bytes + 8 * HW * 4 + (2 << 20))))

    if n_cblk == 1:
        # Whole channel axis fits one tile: single-pass kernel, no scratch,
        # no init/finalize branches.
        maps_flat = pl.pallas_call(
            functools.partial(_channel_reduce_single_kernel, C=C),
            out_shape=jax.ShapeDtypeStruct((N, 2, HW), jnp.float32),
            grid=(N,),
            in_specs=[pl.BlockSpec((1, C, HW), lambda b: (b, 0, 0))],
            out_specs=pl.BlockSpec((1, 2, HW), lambda b: (b, 0, 0)),
            compiler_params=pltpu.CompilerParams(
                dimension_semantics=("parallel",),
                vmem_limit_bytes=vmem_limit),
        )(x_flat)
    else:
        maps_flat = pl.pallas_call(
            functools.partial(_channel_reduce_kernel, C=C, C_blk=c_blk),
            out_shape=jax.ShapeDtypeStruct((N, 2, HW), jnp.float32),
            grid=(N, n_cblk),
            in_specs=[pl.BlockSpec((1, c_blk, HW), lambda b, c: (b, c, 0))],
            out_specs=pl.BlockSpec((1, 2, HW), lambda b, c: (b, 0, 0)),
            scratch_shapes=[pltpu.VMEM((1, HW), jnp.float32),
                            pltpu.VMEM((1, HW), jnp.float32)],
            compiler_params=pltpu.CompilerParams(
                dimension_semantics=("parallel", "arbitrary"),
                vmem_limit_bytes=vmem_limit),
        )(x_flat)

    maps = maps_flat.reshape(N, 2, H, W)              # free reshape

    band = _build_band(conv_weight, W)
    out = pl.pallas_call(
        functools.partial(_conv_sigmoid_kernel, H=H, W=W),
        out_shape=jax.ShapeDtypeStruct((N, 1, H, W), x.dtype),
        grid=(N,),
        in_specs=[pl.BlockSpec((1, 2, H, W), lambda b: (b, 0, 0, 0)),
                  pl.BlockSpec((2, KSIZE, W, W), lambda b: (0, 0, 0, 0))],
        out_specs=pl.BlockSpec((1, 1, H, W), lambda b: (b, 0, 0, 0)),
        scratch_shapes=[pltpu.VMEM((2, H + 2 * PAD, W), jnp.float32)],
        compiler_params=pltpu.CompilerParams(dimension_semantics=("parallel",)),
    )(maps, band)
    return out


# -------- Reference + test ------------------------------------------------------

def _reference(x, conv_weight):
    avg = jnp.mean(x, axis=1, keepdims=True)
    mx = jnp.max(x, axis=1, keepdims=True)
    cat = jnp.concatenate([avg, mx], axis=1)
    y = jax.lax.conv_general_dilated(
        cat, conv_weight, window_strides=(1, 1),
        padding=((PAD, PAD), (PAD, PAD)),
        dimension_numbers=("NCHW", "OIHW", "NCHW"),
        precision=jax.lax.Precision.HIGHEST)
    return jax.nn.sigmoid(y)


if __name__ == "__main__":
    key = jax.random.PRNGKey(0)
    k_w, k_x = jax.random.split(key)

    # Deterministic Conv2d(2, 1, 7, bias=False) weight init (uniform +/- 1/sqrt(fan_in)).
    fan_in = 2 * KSIZE * KSIZE
    bound = 1.0 / np.sqrt(fan_in)
    conv_weight = jax.random.uniform(
        k_w, (1, 2, KSIZE, KSIZE), dtype=jnp.float32, minval=-bound, maxval=bound)

    x = jax.random.normal(k_x, (2, 4, 16, 16), dtype=jnp.float32)

    sa = jax.jit(spatial_attention)
    out = jax.block_until_ready(sa(x, conv_weight))
    ref = jax.block_until_ready(_reference(x, conv_weight))

    assert out.shape == (2, 1, 16, 16), out.shape
    err = float(jnp.max(jnp.abs(out.astype(jnp.float32) - ref.astype(jnp.float32))))
    # Conv matmuls run at HIGHEST precision; tolerance kept conservative for the
    # post-sigmoid gate values.
    assert err < 5e-3, err
    print("KERNEL_OK")
</pallas_src>

<mosaic_0001>
module attributes {stable_mosaic.version = 11 : i64} {
  func.func @_channel_reduce_single_kernel(%arg0: i32, %arg1: memref<1x4x256xf32, #tpu.memory_space<vmem>>, %arg2: memref<1x2x256xf32, #tpu.memory_space<vmem>>) attributes {dimension_semantics = [#tpu.dimension_semantics<parallel>], iteration_bounds = array<i64: 2>, scalar_prefetch = 0 : i64, scratch_operands = 0 : i64, tpu.core_type = #tpu.core_type<tc>, window_params = [{transform_indices = @transform_0, window_bounds = array<i64: 1, 4, 256>}, {transform_indices = @transform_1, window_bounds = array<i64: 1, 2, 256>}]} {
    %c0 = arith.constant 0 : index
    %c0_0 = arith.constant 0 : index
    %c0_1 = arith.constant 0 : index
    %0 = vector.load %arg1[%c0, %c0_0, %c0_1] : memref<1x4x256xf32, #tpu.memory_space<vmem>>, vector<1x4x256xf32>
    %1 = vector.shape_cast %0 : vector<1x4x256xf32> to vector<4x256xf32>
    %cst = arith.constant dense<0.000000e+00> : vector<256xf32>
    %2 = vector.multi_reduction <add>, %1, %cst [0] : vector<4x256xf32> to vector<256xf32>
    %3 = vector.shape_cast %2 : vector<256xf32> to vector<1x256xf32>
    %cst_2 = arith.constant 2.500000e-01 : f32
    %4 = vector.broadcast %cst_2 : f32 to vector<1x256xf32>
    %5 = arith.mulf %3, %4 : vector<1x256xf32>
    %c0_3 = arith.constant 0 : index
    %c0_4 = arith.constant 0 : index
    %c0_5 = arith.constant 0 : index
    %6 = vector.load %arg2[%c0_3, %c0_4, %c0_5] : memref<1x2x256xf32, #tpu.memory_space<vmem>>, vector<1x1x256xf32>
    %7 = vector.shape_cast %6 : vector<1x1x256xf32> to vector<1x256xf32>
    %8 = vector.shape_cast %5 : vector<1x256xf32> to vector<1x1x256xf32>
    tpu.vector_store %arg2[%c0_3, %c0_4, %c0_5], %8 {strides = array<i32>} : memref<1x2x256xf32, #tpu.memory_space<vmem>>, vector<1x1x256xf32>,
    %cst_6 = arith.constant dense<0xFF800000> : vector<256xf32>
    %9 = vector.multi_reduction <maximumf>, %1, %cst_6 [0] : vector<4x256xf32> to vector<256xf32>
    %10 = vector.shape_cast %9 : vector<256xf32> to vector<1x256xf32>
    %c0_7 = arith.constant 0 : index
    %c1 = arith.constant 1 : index
    %c0_8 = arith.constant 0 : index
    %11 = vector.load %arg2[%c0_7, %c1, %c0_8] : memref<1x2x256xf32, #tpu.memory_space<vmem>>, vector<1x1x256xf32>
    %12 = vector.shape_cast %11 : vector<1x1x256xf32> to vector<1x256xf32>
    %13 = vector.shape_cast %10 : vector<1x256xf32> to vector<1x1x256xf32>
    tpu.vector_store %arg2[%c0_7, %c1, %c0_8], %13 {strides = array<i32>} : memref<1x2x256xf32, #tpu.memory_space<vmem>>, vector<1x1x256xf32>,
    return
  }
  func.func @transform_0(%arg0: i32) -> (i32, i32, i32) {
    %c0_i32 = arith.constant 0 : i32
    %c0_i32_0 = arith.constant 0 : i32
    %c0_i32_1 = arith.constant 0 : i32
    return %arg0, %c0_i32, %c0_i32_0 : i32, i32, i32
  }
  func.func @transform_1(%arg0: i32) -> (i32, i32, i32) {
    %c0_i32 = arith.constant 0 : i32
    %c0_i32_0 = arith.constant 0 : i32
    %c0_i32_1 = arith.constant 0 : i32
    return %arg0, %c0_i32, %c0_i32_0 : i32, i32, i32
  }
}

module attributes {stable_mosaic.version = 11 : i64} {
  func.func @_conv_sigmoid_kernel(%arg0: i32, %arg1: memref<1x2x16x16xf32, #tpu.memory_space<vmem>>, %arg2: memref<2x7x16x16xf32, #tpu.memory_space<vmem>>, %arg3: memref<1x1x16x16xf32, #tpu.memory_space<vmem>>, %arg4: memref<2x22x16xf32, #tpu.memory_space<vmem>>) attributes {dimension_semantics = [#tpu.dimension_semantics<parallel>], iteration_bounds = array<i64: 2>, scalar_prefetch = 0 : i64, scratch_operands = 1 : i64, tpu.core_type = #tpu.core_type<tc>, window_params = [{transform_indices = @transform_0, window_bounds = array<i64: 1, 2, 16, 16>}, {pipeline_mode = #tpu.pipeline_mode<synchronous>, transform_indices = @transform_1, window_bounds = array<i64: 2, 7, 16, 16>}, {transform_indices = @transform_2, window_bounds = array<i64: 1, 1, 16, 16>}]} {
    %cst = arith.constant 0.000000e+00 : f32
    %0 = vector.broadcast %cst : f32 to vector<3x16xf32>
    %c0 = arith.constant 0 : index
    %c0_0 = arith.constant 0 : index
    %c0_1 = arith.constant 0 : index
    %1 = vector.load %arg4[%c0, %c0_0, %c0_1] : memref<2x22x16xf32, #tpu.memory_space<vmem>>, vector<1x3x16xf32>
    %2 = vector.shape_cast %1 : vector<1x3x16xf32> to vector<3x16xf32>
    %3 = vector.shape_cast %0 : vector<3x16xf32> to vector<1x3x16xf32>
    tpu.vector_store %arg4[%c0, %c0_0, %c0_1], %3 {strides = array<i32>} : memref<2x22x16xf32, #tpu.memory_space<vmem>>, vector<1x3x16xf32>,
    %c0_2 = arith.constant 0 : index
    %c19 = arith.constant 19 : index
    %c0_3 = arith.constant 0 : index
    %4 = vector.load %arg4[%c0_2, %c19, %c0_3] : memref<2x22x16xf32, #tpu.memory_space<vmem>>, vector<1x3x16xf32>
    %5 = vector.shape_cast %4 : vector<1x3x16xf32> to vector<3x16xf32>
    %6 = vector.shape_cast %0 : vector<3x16xf32> to vector<1x3x16xf32>
    tpu.vector_store %arg4[%c0_2, %c19, %c0_3], %6 {strides = array<i32>} : memref<2x22x16xf32, #tpu.memory_space<vmem>>, vector<1x3x16xf32>,
    %c0_4 = arith.constant 0 : index
    %c0_5 = arith.constant 0 : index
    %c0_6 = arith.constant 0 : index
    %c0_7 = arith.constant 0 : index
    %7 = vector.load %arg1[%c0_4, %c0_5, %c0_6, %c0_7] : memref<1x2x16x16xf32, #tpu.memory_space<vmem>>, vector<1x1x16x16xf32>
    %8 = vector.shape_cast %7 : vector<1x1x16x16xf32> to vector<16x16xf32>
    %c0_8 = arith.constant 0 : index
    %c3 = arith.constant 3 : index
    %c0_9 = arith.constant 0 : index
    %9 = vector.load %arg4[%c0_8, %c3, %c0_9] : memref<2x22x16xf32, #tpu.memory_space<vmem>>, vector<1x16x16xf32>
    %10 = vector.shape_cast %9 : vector<1x16x16xf32> to vector<16x16xf32>
    %11 = vector.shape_cast %8 : vector<16x16xf32> to vector<1x16x16xf32>
    tpu.vector_store %arg4[%c0_8, %c3, %c0_9], %11 {strides = array<i32>} : memref<2x22x16xf32, #tpu.memory_space<vmem>>, vector<1x16x16xf32>,
    %c1 = arith.constant 1 : index
    %c0_10 = arith.constant 0 : index
    %c0_11 = arith.constant 0 : index
    %12 = vector.load %arg4[%c1, %c0_10, %c0_11] : memref<2x22x16xf32, #tpu.memory_space<vmem>>, vector<1x3x16xf32>
    %13 = vector.shape_cast %12 : vector<1x3x16xf32> to vector<3x16xf32>
    %14 = vector.shape_cast %0 : vector<3x16xf32> to vector<1x3x16xf32>
    tpu.vector_store %arg4[%c1, %c0_10, %c0_11], %14 {strides = array<i32>} : memref<2x22x16xf32, #tpu.memory_space<vmem>>, vector<1x3x16xf32>,
    %c1_12 = arith.constant 1 : index
    %c19_13 = arith.constant 19 : index
    %c0_14 = arith.constant 0 : index
    %15 = vector.load %arg4[%c1_12, %c19_13, %c0_14] : memref<2x22x16xf32, #tpu.memory_space<vmem>>, vector<1x3x16xf32>
    %16 = vector.shape_cast %15 : vector<1x3x16xf32> to vector<3x16xf32>
    %17 = vector.shape_cast %0 : vector<3x16xf32> to vector<1x3x16xf32>
    tpu.vector_store %arg4[%c1_12, %c19_13, %c0_14], %17 {strides = array<i32>} : memref<2x22x16xf32, #tpu.memory_space<vmem>>, vector<1x3x16xf32>,
    %c0_15 = arith.constant 0 : index
    %c1_16 = arith.constant 1 : index
    %c0_17 = arith.constant 0 : index
    %c0_18 = arith.constant 0 : index
    %18 = vector.load %arg1[%c0_15, %c1_16, %c0_17, %c0_18] : memref<1x2x16x16xf32, #tpu.memory_space<vmem>>, vector<1x1x16x16xf32>
    %19 = vector.shape_cast %18 : vector<1x1x16x16xf32> to vector<16x16xf32>
    %c1_19 = arith.constant 1 : index
    %c3_20 = arith.constant 3 : index
    %c0_21 = arith.constant 0 : index
    %20 = vector.load %arg4[%c1_19, %c3_20, %c0_21] : memref<2x22x16xf32, #tpu.memory_space<vmem>>, vector<1x16x16xf32>
    %21 = vector.shape_cast %20 : vector<1x16x16xf32> to vector<16x16xf32>
    %22 = vector.shape_cast %19 : vector<16x16xf32> to vector<1x16x16xf32>
    tpu.vector_store %arg4[%c1_19, %c3_20, %c0_21], %22 {strides = array<i32>} : memref<2x22x16xf32, #tpu.memory_space<vmem>>, vector<1x16x16xf32>,
    %cst_22 = arith.constant 0.000000e+00 : f32
    %23 = vector.broadcast %cst_22 : f32 to vector<16x16xf32>
    %c0_23 = arith.constant 0 : index
    %c0_24 = arith.constant 0 : index
    %c0_25 = arith.constant 0 : index
    %24 = vector.load %arg4[%c0_23, %c0_24, %c0_25] : memref<2x22x16xf32, #tpu.memory_space<vmem>>, vector<1x16x16xf32>
    %25 = vector.shape_cast %24 : vector<1x16x16xf32> to vector<16x16xf32>
    %c0_26 = arith.constant 0 : index
    %c0_27 = arith.constant 0 : index
    %c0_28 = arith.constant 0 : index
    %c0_29 = arith.constant 0 : index
    %26 = vector.load %arg2[%c0_26, %c0_27, %c0_28, %c0_29] : memref<2x7x16x16xf32, #tpu.memory_space<vmem>>, vector<1x1x16x16xf32>
    %27 = vector.shape_cast %26 : vector<1x1x16x16xf32> to vector<16x16xf32>
    %cst_30 = arith.constant dense<0.000000e+00> : vector<16x16xf32>
    %28 = tpu.matmul %25, %27, %cst_30 {dimension_numbers = #tpu.dot_dimension_numbers<[1], [0], [0], [1], [0, 0, 1, 1], [], []>, precision = #tpu.contract_precision<fp32>} : vector<16x16xf32>, vector<16x16xf32>, vector<16x16xf32> -> vector<16x16xf32>
    %29 = arith.addf %23, %28 : vector<16x16xf32>
    %c0_31 = arith.constant 0 : index
    %c1_32 = arith.constant 1 : index
    %c0_33 = arith.constant 0 : index
    %30 = vector.load %arg4[%c0_31, %c1_32, %c0_33] : memref<2x22x16xf32, #tpu.memory_space<vmem>>, vector<1x16x16xf32>
    %31 = vector.shape_cast %30 : vector<1x16x16xf32> to vector<16x16xf32>
    %c0_34 = arith.constant 0 : index
    %c1_35 = arith.constant 1 : index
    %c0_36 = arith.constant 0 : index
    %c0_37 = arith.constant 0 : index
    %32 = vector.load %arg2[%c0_34, %c1_35, %c0_36, %c0_37] : memref<2x7x16x16xf32, #tpu.memory_space<vmem>>, vector<1x1x16x16xf32>
    %33 = vector.shape_cast %32 : vector<1x1x16x16xf32> to vector<16x16xf32>
    %cst_38 = arith.constant dense<0.000000e+00> : vector<16x16xf32>
    %34 = tpu.matmul %31, %33, %cst_38 {dimension_numbers = #tpu.dot_dimension_numbers<[1], [0], [0], [1], [0, 0, 1, 1], [], []>, precision = #tpu.contract_precision<fp32>} : vector<16x16xf32>, vector<16x16xf32>, vector<16x16xf32> -> vector<16x16xf32>
    %35 = arith.addf %29, %34 : vector<16x16xf32>
    %c0_39 = arith.constant 0 : index
    %c2 = arith.constant 2 : index
    %c0_40 = arith.constant 0 : index
    %36 = vector.load %arg4[%c0_39, %c2, %c0_40] : memref<2x22x16xf32, #tpu.memory_space<vmem>>, vector<1x16x16xf32>
    %37 = vector.shape_cast %36 : vector<1x16x16xf32> to vector<16x16xf32>
    %c0_41 = arith.constant 0 : index
    %c2_42 = arith.constant 2 : index
    %c0_43 = arith.constant 0 : index
    %c0_44 = arith.constant 0 : index
    %38 = vector.load %arg2[%c0_41, %c2_42, %c0_43, %c0_44] : memref<2x7x16x16xf32, #tpu.memory_space<vmem>>, vector<1x1x16x16xf32>
    %39 = vector.shape_cast %38 : vector<1x1x16x16xf32> to vector<16x16xf32>
    %cst_45 = arith.constant dense<0.000000e+00> : vector<16x16xf32>
    %40 = tpu.matmul %37, %39, %cst_45 {dimension_numbers = #tpu.dot_dimension_numbers<[1], [0], [0], [1], [0, 0, 1, 1], [], []>, precision = #tpu.contract_precision<fp32>} : vector<16x16xf32>, vector<16x16xf32>, vector<16x16xf32> -> vector<16x16xf32>
    %41 = arith.addf %35, %40 : vector<16x16xf32>
    %c0_46 = arith.constant 0 : index
    %c3_47 = arith.constant 3 : index
    %c0_48 = arith.constant 0 : index
    %42 = vector.load %arg4[%c0_46, %c3_47, %c0_48] : memref<2x22x16xf32, #tpu.memory_space<vmem>>, vector<1x16x16xf32>
    %43 = vector.shape_cast %42 : vector<1x16x16xf32> to vector<16x16xf32>
    %c0_49 = arith.constant 0 : index
    %c3_50 = arith.constant 3 : index
    %c0_51 = arith.constant 0 : index
    %c0_52 = arith.constant 0 : index
    %44 = vector.load %arg2[%c0_49, %c3_50, %c0_51, %c0_52] : memref<2x7x16x16xf32, #tpu.memory_space<vmem>>, vector<1x1x16x16xf32>
    %45 = vector.shape_cast %44 : vector<1x1x16x16xf32> to vector<16x16xf32>
    %cst_53 = arith.constant dense<0.000000e+00> : vector<16x16xf32>
    %46 = tpu.matmul %43, %45, %cst_53 {dimension_numbers = #tpu.dot_dimension_numbers<[1], [0], [0], [1], [0, 0, 1, 1], [], []>, precision = #tpu.contract_precision<fp32>} : vector<16x16xf32>, vector<16x16xf32>, vector<16x16xf32> -> vector<16x16xf32>
    %47 = arith.addf %41, %46 : vector<16x16xf32>
    %c0_54 = arith.constant 0 : index
    %c4 = arith.constant 4 : index
    %c0_55 = arith.constant 0 : index
    %48 = vector.load %arg4[%c0_54, %c4, %c0_55] : memref<2x22x16xf32, #tpu.memory_space<vmem>>, vector<1x16x16xf32>
    %49 = vector.shape_cast %48 : vector<1x16x16xf32> to vector<16x16xf32>
    %c0_56 = arith.constant 0 : index
    %c4_57 = arith.constant 4 : index
    %c0_58 = arith.constant 0 : index
    %c0_59 = arith.constant 0 : index
    %50 = vector.load %arg2[%c0_56, %c4_57, %c0_58, %c0_59] : memref<2x7x16x16xf32, #tpu.memory_space<vmem>>, vector<1x1x16x16xf32>
    %51 = vector.shape_cast %50 : vector<1x1x16x16xf32> to vector<16x16xf32>
    %cst_60 = arith.constant dense<0.000000e+00> : vector<16x16xf32>
    %52 = tpu.matmul %49, %51, %cst_60 {dimension_numbers = #tpu.dot_dimension_numbers<[1], [0], [0], [1], [0, 0, 1, 1], [], []>, precision = #tpu.contract_precision<fp32>} : vector<16x16xf32>, vector<16x16xf32>, vector<16x16xf32> -> vector<16x16xf32>
    %53 = arith.addf %47, %52 : vector<16x16xf32>
    %c0_61 = arith.constant 0 : index
    %c5 = arith.constant 5 : index
    %c0_62 = arith.constant 0 : index
    %54 = vector.load %arg4[%c0_61, %c5, %c0_62] : memref<2x22x16xf32, #tpu.memory_space<vmem>>, vector<1x16x16xf32>
    %55 = vector.shape_cast %54 : vector<1x16x16xf32> to vector<16x16xf32>
    %c0_63 = arith.constant 0 : index
    %c5_64 = arith.constant 5 : index
    %c0_65 = arith.constant 0 : index
    %c0_66 = arith.constant 0 : index
    %56 = vector.load %arg2[%c0_63, %c5_64, %c0_65, %c0_66] : memref<2x7x16x16xf32, #tpu.memory_space<vmem>>, vector<1x1x16x16xf32>
    %57 = vector.shape_cast %56 : vector<1x1x16x16xf32> to vector<16x16xf32>
    %cst_67 = arith.constant dense<0.000000e+00> : vector<16x16xf32>
    %58 = tpu.matmul %55, %57, %cst_67 {dimension_numbers = #tpu.dot_dimension_numbers<[1], [0], [0], [1], [0, 0, 1, 1], [], []>, precision = #tpu.contract_precision<fp32>} : vector<16x16xf32>, vector<16x16xf32>, vector<16x16xf32> -> vector<16x16xf32>
    %59 = arith.addf %53, %58 : vector<16x16xf32>
    %c0_68 = arith.constant 0 : index
    %c6 = arith.constant 6 : index
    %c0_69 = arith.constant 0 : index
    %60 = vector.load %arg4[%c0_68, %c6, %c0_69] : memref<2x22x16xf32, #tpu.memory_space<vmem>>, vector<1x16x16xf32>
    %61 = vector.shape_cast %60 : vector<1x16x16xf32> to vector<16x16xf32>
    %c0_70 = arith.constant 0 : index
    %c6_71 = arith.constant 6 : index
    %c0_72 = arith.constant 0 : index
    %c0_73 = arith.constant 0 : index
    %62 = vector.load %arg2[%c0_70, %c6_71, %c0_72, %c0_73] : memref<2x7x16x16xf32, #tpu.memory_space<vmem>>, vector<1x1x16x16xf32>
    %63 = vector.shape_cast %62 : vector<1x1x16x16xf32> to vector<16x16xf32>
    %cst_74 = arith.constant dense<0.000000e+00> : vector<16x16xf32>
    %64 = tpu.matmul %61, %63, %cst_74 {dimension_numbers = #tpu.dot_dimension_numbers<[1], [0], [0], [1], [0, 0, 1, 1], [], []>, precision = #tpu.contract_precision<fp32>} : vector<16x16xf32>, vector<16x16xf32>, vector<16x16xf32> -> vector<16x16xf32>
    %65 = arith.addf %59, %64 : vector<16x16xf32>
    %c1_75 = arith.constant 1 : index
    %c0_76 = arith.constant 0 : index
    %c0_77 = arith.constant 0 : index
    %66 = vector.load %arg4[%c1_75, %c0_76, %c0_77] : memref<2x22x16xf32, #tpu.memory_space<vmem>>, vector<1x16x16xf32>
    %67 = vector.shape_cast %66 : vector<1x16x16xf32> to vector<16x16xf32>
    %c1_78 = arith.constant 1 : index
    %c0_79 = arith.constant 0 : index
    %c0_80 = arith.constant 0 : index
    %c0_81 = arith.constant 0 : index
    %68 = vector.load %arg2[%c1_78, %c0_79, %c0_80, %c0_81] : memref<2x7x16x16xf32, #tpu.memory_space<vmem>>, vector<1x1x16x16xf32>
    %69 = vector.shape_cast %68 : vector<1x1x16x16xf32> to vector<16x16xf32>
    %cst_82 = arith.constant dense<0.000000e+00> : vector<16x16xf32>
    %70 = tpu.matmul %67, %69, %cst_82 {dimension_numbers = #tpu.dot_dimension_numbers<[1], [0], [0], [1], [0, 0, 1, 1], [], []>, precision = #tpu.contract_precision<fp32>} : vector<16x16xf32>, vector<16x16xf32>, vector<16x16xf32> -> vector<16x16xf32>
    %71 = arith.addf %65, %70 : vector<16x16xf32>
    %c1_83 = arith.constant 1 : index
    %c1_84 = arith.constant 1 : index
    %c0_85 = arith.constant 0 : index
    %72 = vector.load %arg4[%c1_83, %c1_84, %c0_85] : memref<2x22x16xf32, #tpu.memory_space<vmem>>, vector<1x16x16xf32>
    %73 = vector.shape_cast %72 : vector<1x16x16xf32> to vector<16x16xf32>
    %c1_86 = arith.constant 1 : index
    %c1_87 = arith.constant 1 : index
    %c0_88 = arith.constant 0 : index
    %c0_89 = arith.constant 0 : index
    %74 = vector.load %arg2[%c1_86, %c1_87, %c0_88, %c0_89] : memref<2x7x16x16xf32, #tpu.memory_space<vmem>>, vector<1x1x16x16xf32>
    %75 = vector.shape_cast %74 : vector<1x1x16x16xf32> to vector<16x16xf32>
    %cst_90 = arith.constant dense<0.000000e+00> : vector<16x16xf32>
    %76 = tpu.matmul %73, %75, %cst_90 {dimension_numbers = #tpu.dot_dimension_numbers<[1], [0], [0], [1], [0, 0, 1, 1], [], []>, precision = #tpu.contract_precision<fp32>} : vector<16x16xf32>, vector<16x16xf32>, vector<16x16xf32> -> vector<16x16xf32>
    %77 = arith.addf %71, %76 : vector<16x16xf32>
    %c1_91 = arith.constant 1 : index
    %c2_92 = arith.constant 2 : index
    %c0_93 = arith.constant 0 : index
    %78 = vector.load %arg4[%c1_91, %c2_92, %c0_93] : memref<2x22x16xf32, #tpu.memory_space<vmem>>, vector<1x16x16xf32>
    %79 = vector.shape_cast %78 : vector<1x16x16xf32> to vector<16x16xf32>
    %c1_94 = arith.constant 1 : index
    %c2_95 = arith.constant 2 : index
    %c0_96 = arith.constant 0 : index
    %c0_97 = arith.constant 0 : index
    %80 = vector.load %arg2[%c1_94, %c2_95, %c0_96, %c0_97] : memref<2x7x16x16xf32, #tpu.memory_space<vmem>>, vector<1x1x16x16xf32>
    %81 = vector.shape_cast %80 : vector<1x1x16x16xf32> to vector<16x16xf32>
    %cst_98 = arith.constant dense<0.000000e+00> : vector<16x16xf32>
    %82 = tpu.matmul %79, %81, %cst_98 {dimension_numbers = #tpu.dot_dimension_numbers<[1], [0], [0], [1], [0, 0, 1, 1], [], []>, precision = #tpu.contract_precision<fp32>} : vector<16x16xf32>, vector<16x16xf32>, vector<16x16xf32> -> vector<16x16xf32>
    %83 = arith.addf %77, %82 : vector<16x16xf32>
    %c1_99 = arith.constant 1 : index
    %c3_100 = arith.constant 3 : index
    %c0_101 = arith.constant 0 : index
    %84 = vector.load %arg4[%c1_99, %c3_100, %c0_101] : memref<2x22x16xf32, #tpu.memory_space<vmem>>, vector<1x16x16xf32>
    %85 = vector.shape_cast %84 : vector<1x16x16xf32> to vector<16x16xf32>
    %c1_102 = arith.constant 1 : index
    %c3_103 = arith.constant 3 : index
    %c0_104 = arith.constant 0 : index
    %c0_105 = arith.constant 0 : index
    %86 = vector.load %arg2[%c1_102, %c3_103, %c0_104, %c0_105] : memref<2x7x16x16xf32, #tpu.memory_space<vmem>>, vector<1x1x16x16xf32>
    %87 = vector.shape_cast %86 : vector<1x1x16x16xf32> to vector<16x16xf32>
    %cst_106 = arith.constant dense<0.000000e+00> : vector<16x16xf32>
    %88 = tpu.matmul %85, %87, %cst_106 {dimension_numbers = #tpu.dot_dimension_numbers<[1], [0], [0], [1], [0, 0, 1, 1], [], []>, precision = #tpu.contract_precision<fp32>} : vector<16x16xf32>, vector<16x16xf32>, vector<16x16xf32> -> vector<16x16xf32>
    %89 = arith.addf %83, %88 : vector<16x16xf32>
    %c1_107 = arith.constant 1 : index
    %c4_108 = arith.constant 4 : index
    %c0_109 = arith.constant 0 : index
    %90 = vector.load %arg4[%c1_107, %c4_108, %c0_109] : memref<2x22x16xf32, #tpu.memory_space<vmem>>, vector<1x16x16xf32>
    %91 = vector.shape_cast %90 : vector<1x16x16xf32> to vector<16x16xf32>
    %c1_110 = arith.constant 1 : index
    %c4_111 = arith.constant 4 : index
    %c0_112 = arith.constant 0 : index
    %c0_113 = arith.constant 0 : index
    %92 = vector.load %arg2[%c1_110, %c4_111, %c0_112, %c0_113] : memref<2x7x16x16xf32, #tpu.memory_space<vmem>>, vector<1x1x16x16xf32>
    %93 = vector.shape_cast %92 : vector<1x1x16x16xf32> to vector<16x16xf32>
    %cst_114 = arith.constant dense<0.000000e+00> : vector<16x16xf32>
    %94 = tpu.matmul %91, %93, %cst_114 {dimension_numbers = #tpu.dot_dimension_numbers<[1], [0], [0], [1], [0, 0, 1, 1], [], []>, precision = #tpu.contract_precision<fp32>} : vector<16x16xf32>, vector<16x16xf32>, vector<16x16xf32> -> vector<16x16xf32>
    %95 = arith.addf %89, %94 : vector<16x16xf32>
    %c1_115 = arith.constant 1 : index
    %c5_116 = arith.constant 5 : index
    %c0_117 = arith.constant 0 : index
    %96 = vector.load %arg4[%c1_115, %c5_116, %c0_117] : memref<2x22x16xf32, #tpu.memory_space<vmem>>, vector<1x16x16xf32>
    %97 = vector.shape_cast %96 : vector<1x16x16xf32> to vector<16x16xf32>
    %c1_118 = arith.constant 1 : index
    %c5_119 = arith.constant 5 : index
    %c0_120 = arith.constant 0 : index
    %c0_121 = arith.constant 0 : index
    %98 = vector.load %arg2[%c1_118, %c5_119, %c0_120, %c0_121] : memref<2x7x16x16xf32, #tpu.memory_space<vmem>>, vector<1x1x16x16xf32>
    %99 = vector.shape_cast %98 : vector<1x1x16x16xf32> to vector<16x16xf32>
    %cst_122 = arith.constant dense<0.000000e+00> : vector<16x16xf32>
    %100 = tpu.matmul %97, %99, %cst_122 {dimension_numbers = #tpu.dot_dimension_numbers<[1], [0], [0], [1], [0, 0, 1, 1], [], []>, precision = #tpu.contract_precision<fp32>} : vector<16x16xf32>, vector<16x16xf32>, vector<16x16xf32> -> vector<16x16xf32>
    %101 = arith.addf %95, %100 : vector<16x16xf32>
    %c1_123 = arith.constant 1 : index
    %c6_124 = arith.constant 6 : index
    %c0_125 = arith.constant 0 : index
    %102 = vector.load %arg4[%c1_123, %c6_124, %c0_125] : memref<2x22x16xf32, #tpu.memory_space<vmem>>, vector<1x16x16xf32>
    %103 = vector.shape_cast %102 : vector<1x16x16xf32> to vector<16x16xf32>
    %c1_126 = arith.constant 1 : index
    %c6_127 = arith.constant 6 : index
    %c0_128 = arith.constant 0 : index
    %c0_129 = arith.constant 0 : index
    %104 = vector.load %arg2[%c1_126, %c6_127, %c0_128, %c0_129] : memref<2x7x16x16xf32, #tpu.memory_space<vmem>>, vector<1x1x16x16xf32>
    %105 = vector.shape_cast %104 : vector<1x1x16x16xf32> to vector<16x16xf32>
    %cst_130 = arith.constant dense<0.000000e+00> : vector<16x16xf32>
    %106 = tpu.matmul %103, %105, %cst_130 {dimension_numbers = #tpu.dot_dimension_numbers<[1], [0], [0], [1], [0, 0, 1, 1], [], []>, precision = #tpu.contract_precision<fp32>} : vector<16x16xf32>, vector<16x16xf32>, vector<16x16xf32> -> vector<16x16xf32>
    %107 = arith.addf %101, %106 : vector<16x16xf32>
    %108 = arith.negf %107 : vector<16x16xf32>
    %109 = math.exp %108 : vector<16x16xf32>
    %cst_131 = arith.constant 1.000000e+00 : f32
    %110 = vector.broadcast %cst_131 : f32 to vector<16x16xf32>
    %111 = arith.addf %110, %109 : vector<16x16xf32>
    %112 = arith.divf %110, %111 : vector<16x16xf32>
    %c0_132 = arith.constant 0 : index
    %c0_133 = arith.constant 0 : index
    %c0_134 = arith.constant 0 : index
    %c0_135 = arith.constant 0 : index
    %113 = vector.load %arg3[%c0_132, %c0_133, %c0_134, %c0_135] : memref<1x1x16x16xf32, #tpu.memory_space<vmem>>, vector<1x1x16x16xf32>
    %114 = vector.shape_cast %113 : vector<1x1x16x16xf32> to vector<16x16xf32>
    %115 = vector.shape_cast %112 : vector<16x16xf32> to vector<1x1x16x16xf32>
    tpu.vector_store %arg3[%c0_132, %c0_133, %c0_134, %c0_135], %115 {strides = array<i32>} : memref<1x1x16x16xf32, #tpu.memory_space<vmem>>, vector<1x1x16x16xf32>,
    return
  }
  func.func @transform_0(%arg0: i32) -> (i32, i32, i32, i32) {
    %c0_i32 = arith.constant 0 : i32
    %c0_i32_0 = arith.constant 0 : i32
    %c0_i32_1 = arith.constant 0 : i32
    %c0_i32_2 = arith.constant 0 : i32
    return %arg0, %c0_i32, %c0_i32_0, %c0_i32_1 : i32, i32, i32, i32
  }
  func.func @transform_1(%arg0: i32) -> (i32, i32, i32, i32) {
    %c0_i32 = arith.constant 0 : i32
    %c0_i32_0 = arith.constant 0 : i32
    %c0_i32_1 = arith.constant 0 : i32
    %c0_i32_2 = arith.constant 0 : i32
    %c0_i32_3 = arith.constant 0 : i32
    return %c0_i32, %c0_i32_0, %c0_i32_1, %c0_i32_2 : i32, i32, i32, i32
  }
  func.func @transform_2(%arg0: i32) -> (i32, i32, i32, i32) {
    %c0_i32 = arith.constant 0 : i32
    %c0_i32_0 = arith.constant 0 : i32
    %c0_i32_1 = arith.constant 0 : i32
    %c0_i32_2 = arith.constant 0 : i32
    return %arg0, %c0_i32, %c0_i32_0, %c0_i32_1 : i32, i32, i32, i32
  }
}

</mosaic_0001>

<bundles_post_ra>
// kernel: spatial_attention.2
= control target key start
LH: loop header
LB: loop body
LE: loop exit
PB: predicated region body
PF: predicated region fallthrough
CT: control target
= control target key end

     0   :  { %s293_s6 = smov 0   ;;  %s314_s0 = inlined_call_operand.vmem [shape: f32[2,4,256], index: 0, kind: input, shape index: {}]   ;;  %s315_s1 = inlined_call_operand.vmem [shape: f32[2,2,256], index: 1, kind: output, shape index: {}]  }
   0x1 LB: > { %s250_s7 = sadd.s32 4294967295, %s280_s6   ;;  %p254_p0 = scmp.ge.s32.totalorder %s280_s6, 1  ;;  %s280_s6 = sphi %s293_s6, %s11_s6  }
   0x2   : > { %p87_p1 = scmp.lt.s32.totalorder %s280_s6, 3 }
   0x4   : > { %p88_p2 = pnand %p254_p0, %p87_p1 }
   0x5   : > { %p107_p3 = scmp.lt.s32.totalorder (!%p88_p2), %s250_s7, 1 }
   0x6   : > { %91 = sbr.rel (%p88_p2) target bundleno = 39 (0x27), region = 24 }
   0xb   : > { %s317_s7 = smov (!%p107_p3, %s250_s7), 1  ;;  %vm121_vm0 = vcmask 1043456   ;;  %v282_v12 = vmov 1966171168   ;;  %v144_v14 = vlaneseq }
   0xc   : > { %s262_s8 = sshll.u32 %s317_s7, 3  ;;  %v142_v13 = vunpack.c.l.s4 %v282_v12  ;;  %s263_s12 = sshll.u32 %s317_s7, 2 }
   0xd   : > { %s111_s11 = scalar_lea.vmem %s314_s0, %s262_s8  ;;  %v145_v24 = vshrl.u32 %v144_v14, 7  ;;  %s116_s15 = scalar_lea.vmem %s315_s1, %s263_s12  ;;  %vm158_vm1 = vcmp.lt.s32.totalorder %v144_v14, 256 }
   0xe   : > { %v117_v0 = vld [vmem:[%s111_s11] sm:$0xff]  ;;  %v143_v23 = vunpack.c.0.s8 %v142_v13 }
   0xf   : > { %v119_v1 = vcombine.high %v117_v0, %v117_v0  ;;  %v122_v2 = vsel %vm121_vm0, %v117_v0, 0.0  ;;  %v161_v3 = vsel %vm121_vm0, %v117_v0, -inf }
  0x10   : > { %v123_v4 = vrot.slane %v122_v2, 4  ;;  %v162_v5 = vrot.slane %v161_v3, 4  ;;  %v146_v35 = vsub.s32 %v143_v23, %v145_v24 }
  0x11   : > { %v129_v6 = vsel %vm121_vm0, %v119_v1, 0.0  ;;  %v168_v7 = vsel %vm121_vm0, %v119_v1, -inf }
  0x12   : > { %v124_v8 = vadd.f32 %v123_v4, %v122_v2  ;;  %v130_v9 = vrot.slane %v129_v6, 4  ;;  %v163_v10 = vmax.f32 %v161_v3, %v162_v5  ;;  %v169_v11 = vrot.slane %v168_v7, 4 }
  0x14   : > { %v125_v15 = vrot.slane %v124_v8, 2  ;;  %v131_v16 = vadd.f32 %v130_v9, %v129_v6  ;;  %v164_v17 = vrot.slane %v163_v10, 2  ;;  %v170_v18 = vmax.f32 %v168_v7, %v169_v11 }
  0x16   : > { %v126_v19 = vadd.f32 %v125_v15, %v124_v8  ;;  %v132_v20 = vrot.slane %v131_v16, 2  ;;  %v165_v21 = vmax.f32 %v163_v10, %v164_v17  ;;  %v171_v22 = vrot.slane %v170_v18, 2 }
  0x18   : > { %v127_v25 = vrot.slane %v126_v19, 1  ;;  %v133_v26 = vadd.f32 %v132_v20, %v131_v16  ;;  %v166_v27 = vrot.slane %v165_v21, 1  ;;  %v172_v28 = vmax.f32 %v170_v18, %v171_v22 }
  0x1a   : > { %v128_v29 = vadd.f32 %v127_v25, %v126_v19  ;;  %v134_v30 = vrot.slane %v133_v26, 1  ;;  %v167_v31 = vmax.f32 %v165_v21, %v166_v27  ;;  %v173_v32 = vrot.slane %v172_v28, 1 }
  0x1c   : > { %v135_v33 = vadd.f32 %v134_v30, %v133_v26  ;;  %v136_v34 = vmul.f32 0.25, %v128_v29  ;;  %v174_v36 = vmax.f32 %v172_v28, %v173_v32 }
  0x1e   : > { %v137_v37 = vmul.f32 0.25, %v135_v33  ;;  %v177_v38 = vcombine.low %v167_v31, %v174_v36 }
  0x20   : > { %v140_v39 = vcombine.low %v136_v34, %v137_v37  ;;  %v184_v40 = vrot.slane %v177_v38, %v146_v35 }
  0x22   : > { %v147_v41 = vrot.slane %v140_v39, %v146_v35  ;;  %v191_v42 = vrot.slane %v184_v40, %v146_v35 }
  0x24   : > { %v154_v43 = vrot.slane %v147_v41, %v146_v35  ;;  %259 = vst.msk [vmem:[%s116_s15 + $0x1] ss:$2 sm:$0x3] %vm158_vm1, %v191_v42 }
  0x26   : > { %160 = vst.msk [vmem:[%s116_s15] ss:$2 sm:$0x3] %vm158_vm1, %v154_v43 }
  0x27 PF: > { %s11_s6 = sadd.s32 1, %s280_s6  }
  0x28   : > { %p8_p4 = scmp.ge.s32.totalorder %s11_s6, 4  }
  0x2a   :  { %10 = sbr.rel (!%p8_p4) target bundleno = 1 (0x1), region = 55 }

// kernel: spatial_attention.3
= control target key start
LH: loop header
LB: loop body
LE: loop exit
PB: predicated region body
PF: predicated region fallthrough
CT: control target
= control target key end

     0   :  { %7 = vsyncpa [#allocation4], 0  ;;  %s9750_s0 = inlined_call_operand.vmem [shape: f32[2,2,16,16], index: 0, kind: input, shape index: {}]   ;;  %s9751_s1 = inlined_call_operand.vmem [shape: f32[2,7,16,16], index: 1, kind: input, shape index: {}]   ;;  %s9752_s2 = inlined_call_operand.hbm [shape: f32[2,1,16,16], index: 2, kind: output, shape index: {}]  }
   0x1   :  { %9 = vsyncpa [#allocation4 + $0x1], 0  ;;  %s8552_s9 = smov 0   ;;  %s8554_s10 = smov 0  }
   0x2   :  { %s8556_s11 = smov 0   ;;  %s8558_s12 = smov 0  }
   0x3 LB: > { %s8573_s13 = sadd.s32 4294967295, %s8531_s12   ;;  %s7453_s14 = sadd.s32 4294967294, %s8531_s12   ;;  %s8531_s12 = sphi %s8558_s12, %s9796_s12   ;;  %s8527_s11 = sphi %s8556_s11, %s9795_s11   ;;  %s8523_s10 = sphi %s8554_s10, %s9794_s10   ;;  %s8519_s9 = sphi %s8552_s9, %s9793_s9  }
   0x4   : > { %s8577_s15 = sadd.s32 1, %s8531_s12   ;;  %s69_s16 = sadd.s32 1, %s8527_s11 }
   0x5   : > { %s66_s17 = ssub.s32 %s8531_s12, %s8577_s15  ;;  %p79_p0 = scmp.ne.s32.totalorder %s8527_s11, %s8523_s10 }
   0x6   : > { %p67_p1 = scmp.eq.s32.totalorder %s66_s17, 0  ;;  %p80_p2 = scmp.eq.s32.totalorder %s8573_s13, 1 }
   0x7   : > { %p85_p3 = scmp.ne.s32.totalorder %s8523_s10, %s8519_s9  ;;  %p86_p4 = scmp.eq.s32.totalorder %s7453_s14, 1 }
   0x8   : > { %s8588_s18 = scalar_select %p67_p1, %s8527_s11, %s69_s16  }
   0x9   : > { %p8590_p5 = por %p80_p2, %p79_p0  ;;  %p8594_p6 = por %p86_p4, %p85_p3 }
   0xa   : > { %p7456_p7 = scmp.ge.s32.totalorder %s8531_s12, 1  ;;  %p115_p8 = scmp.lt.s32.totalorder %s8531_s12, 3 }
   0xc   : > { %p116_p9 = pnand %p7456_p7, %p115_p8 }
   0xe   : > { %119 = sbr.rel (%p116_p9) target bundleno = 532 (0x214), region = 28 }
  0x13   : > { %v7463_v0 = vld [vmem:[%s9751_s1 + $0x18] sm:$0xff]  ;;  %v7462_v1 = vld [vmem:[%s9751_s1 + $0x10] sm:$0xff]  ;;  %p137_p10 = scmp.lt.s32.totalorder %s8573_s13, 1  ;;  %vm142_vm0 = vcmask 124928   ;;  %v8533_v4 = vmov 0.0   ;;  %vm147_vm1 = vcmask 130048  }
  0x14   : > { %v8607_v2 = vand.u32 4294901760, %v7463_v0  ;;  %v8609_v3 = vand.u32 4294901760, %v7462_v1  ;;  %143 = vst.msk [vmem:[#allocation2] sm:$0x7] %vm142_vm0, %v8533_v4  ;;  %144 = vst.msk [vmem:[#allocation2 + $0x13] sm:$0x7] %vm142_vm0, %v8533_v4 }
  0x15   : > { %151 = vst.msk [vmem:[#allocation2 + $0x18] sm:$0x7] %vm142_vm0, %v8533_v4  ;;  %152 = vst.msk [vmem:[#allocation2 + $0x2b] sm:$0x7] %vm142_vm0, %v8533_v4  ;;  %s138_s25 = scalar_select %p137_p10, %s8573_s13, 1  ;;  %v161_v9 = vld [vmem:[%s9751_s1 + $0x8] sm:$0xff] }
  0x16   : > { %7833 = vmatprep.subr.mxu0 %v8607_v2  ;;  %v8614_v5 = vsub.f32 %v7463_v0, %v8607_v2  ;;  %v8617_v6 = vsub.f32 %v7462_v1, %v8609_v3  ;;  %v8643_v18 = vand.u32 4294901760, %v161_v9  ;;  %v160_v19 = vld [vmem:[%s9751_s1] sm:$0xff]  ;;  %v7465_v54 = vld [vmem:[%s9751_s1 + $0x28] sm:$0xff]  ;;  %s7496_s27 = sshll.u32 %s8573_s13, 8  ;;  %s8534_s6 = smov [#allocation3]  }
  0x17   : > { %7834 = vmatpush3.msra.mxu0 %v8607_v2  ;;  %s7495_s26 = sshll.u32 %s138_s25, 5  ;;  %v8651_v21 = vand.u32 4294901760, %v160_v19  ;;  %v7464_v57 = vld [vmem:[%s9751_s1 + $0x20] sm:$0xff]  ;;  %v8708_v60 = vand.u32 4294901760, %v7465_v54  ;;  %s134_s25 = sand.u32 1, %s8523_s10  }
  0x18   : > { %v8621_v7 = vand.u32 4294901760, %v8614_v5  ;;  %7835 = vmatprep.subr.mxu0 %v8609_v3  ;;  %v8625_v8 = vand.u32 4294901760, %v8617_v6  ;;  %s141_s29 = scalar_lea.vmem %s9750_s0, %s7495_s26  ;;  %v8649_v20 = vsub.f32 %v161_v9, %v8643_v18  ;;  %v8713_v62 = vand.u32 4294901760, %v7464_v57  ;;  %s7457_s26 = sshll.u32 %s134_s25, 4 }
  0x19   : > { %7836 = vmatpush3.msra.mxu0 %v8609_v3  ;;  %v145_v10 = vld [vmem:[%s141_s29] sm:$0xff]  ;;  %v146_v11 = vld [vmem:[%s141_s29 + $0x8] sm:$0xff]  ;;  %v7460_v12 = vld [vmem:[%s141_s29 + $0x10] sm:$0xff]  ;;  %v8666_v34 = vsub.f32 %v160_v19, %v8651_v21  ;;  %s136_s28 = scalar_lea.vmem [#allocation3], %s7457_s26  ;;  %s9704_s4 = scalar_lea.hbm %s9752_s2, %s7496_s27 }
  0x1a   : > { %v292_v13 = vsub.f32 %v8614_v5, %v8621_v7  ;;  %v299_v14 = vsub.f32 %v8617_v6, %v8625_v8  ;;  %148 = vst.msk [vmem:[#allocation2 + $0x3] sm:$0xff] %vm147_vm1, %v145_v10  ;;  %7847 = vmatprep.subr.mxu0 %v8614_v5  ;;  %149 = vst.msk [vmem:[#allocation2 + $0xb] sm:$0xff] %vm147_vm1, %v146_v11  ;;  %v7461_v15 = vld [vmem:[%s141_s29 + $0x18] sm:$0xff]  ;;  %v8663_v33 = vand.u32 4294901760, %v8649_v20  ;;  %s7391_s29 = sshll.u32 %s136_s28, 4  ;;  %s9710_s5 = scalar_lea.sflag [#allocation4], %s134_s25  ;;  %s9706_s29 = int_to_ptr.vmem [resolvable:$true] %s7391_s29 }
  0x1b   : > { %156 = vst.msk [vmem:[#allocation2 + $0x1b] sm:$0xff] %vm147_vm1, %v7460_v12  ;;  %157 = vst.msk [vmem:[#allocation2 + $0x23] sm:$0xff] %vm147_vm1, %v7461_v15  ;;  %v8680_v42 = vand.u32 4294901760, %v8666_v34  ;;  %v8731_v4 = vsub.f32 %v7464_v57, %v8713_v62  ;;  %s8471_s13 = scalar_lea.vmem %s9706_s29, 256  ;;  %s8475_s7 = sshll.u32 %s8534_s6, 4  ;;  %s8476_s7 = int_to_ptr.vmem [resolvable:$false] %s8475_s7 }
  0x1c   : > { %v293_v16 = vand.u32 4294901760, %v292_v13  ;;  %v300_v17 = vand.u32 4294901760, %v299_v14  ;;  %v800_v41 = vsub.f32 %v8649_v20, %v8663_v33  ;;  %v7467_v14 = vld [vmem:[%s9751_s1 + $0x38] sm:$0xff]  ;;  %p8472_p11 = scmp.ne.s32.totalorder %s9706_s29, %s8471_s13  ;;  %s8477_s8 = scalar_lea.vmem %s8476_s7, 512 }
  0x1d   : > { %v807_v50 = vsub.f32 %v8666_v34, %v8680_v42  ;;  %p8478_p0 = scmp.lt.s32.totalorder %s9706_s29, %s8476_s7  ;;  %p8479_p1 = scmp.lt.s32.totalorder %s8477_s8, %s8471_s13 }
  0x1e   : > { %7840 = vmatprep.subr.mxu1 %v293_v16  ;;  %v801_v49 = vand.u32 4294901760, %v800_v41  ;;  %p8473_p12 = pnand %p8472_p11, %p8590_p5 }
  0x1f   : > { %7841 = vmatpush3.msra.mxu1 %v293_v16  ;;  %v808_v53 = vand.u32 4294901760, %v807_v50  ;;  %p8480_p2 = por %p8479_p1, %p8478_p0 }
  0x20   : > { %7842 = vmatprep.subr.mxu1 %v300_v17  ;;  %p8474_p13 = pneg %p8473_p12 }
  0x21   : > { %v162_v22 = vld [vmem:[#allocation2 + $0x1] sm:$0xff]  ;;  %7843 = vmatpush3.msra.mxu1 %v300_v17  ;;  %v163_v23 = vld [vmem:[#allocation2 + $0x9] sm:$0xff] }
  0x22   : > { %v158_v24 = vld [vmem:[#allocation2] sm:$0xff]  ;;  %v168_v25 = vsel %vm147_vm1, %v162_v22, 0  ;;  %v171_v26 = vsel %vm147_vm1, %v163_v23, 0  ;;  %7854 = vmatprep.subr.mxu1 %v8607_v2  ;;  %v159_v28 = vld [vmem:[#allocation2 + $0x8] sm:$0xff]  ;;  %v8780_v22 = vand.u32 4294901760, %v7467_v14  ;;  %p8481_p3 = pnand %p8480_p2, %p8474_p13 }
  0x23   : > { %v676_v27 = vsel %vm147_vm1, %v158_v24, 0  ;;  %v240_v29 = vand.u32 4294901760, %v168_v25  ;;  %v8657_v30 = vand.u32 4294901760, %v171_v26  ;;  %v679_v32 = vsel %vm147_vm1, %v159_v28, 0  ;;  %v1183_v55 = vld [vmem:[#allocation2 + $0x2] sm:$0xff]  ;;  %v1184_v58 = vld [vmem:[#allocation2 + $0xa] sm:$0xff] }
  0x24   : > { %v8659_v31 = vand.u32 4294901760, %v676_v27  ;;  %v8670_v37 = vand.u32 4294901760, %v679_v32  ;;  %v1189_v61 = vsel %vm147_vm1, %v1183_v55, 0  ;;  %v1192_v63 = vsel %vm147_vm1, %v1184_v58, 0  ;;  %v1698_v15 = vld [vmem:[#allocation2 + $0x3] sm:$0xff]  ;;  %v1699_v19 = vld [vmem:[#allocation2 + $0xb] sm:$0xff] }
  0x25   : > { %v241_v35 = vsub.f32 %v168_v25, %v240_v29  ;;  %7844 = vmatprep.mubr.f32.mxu1 %v240_v29  ;;  %v251_v36 = vsub.f32 %v171_v26, %v8657_v30  ;;  %v8718_v1 = vand.u32 4294901760, %v1189_v61  ;;  %v1704_v23 = vsel %vm147_vm1, %v1698_v15, 0  ;;  %v2213_v41 = vld [vmem:[#allocation2 + $0x4] sm:$0xff] }
  0x26   : > { %7845 = vmatmul.mubr.f32.vlgmr.msra.gmra.mxu1 %v8657_v30  ;;  %v8674_v40 = vsub.f32 %v676_v27, %v8659_v31  ;;  %v8685_v45 = vsub.f32 %v679_v32, %v8670_v37  ;;  %v1707_v25 = vsel %vm147_vm1, %v1699_v19, 0  ;;  %v8790_v27 = vand.u32 4294901760, %v1704_v23 }
  0x27   : > { %v242_v38 = vand.u32 4294901760, %v241_v35  ;;  %v252_v39 = vand.u32 4294901760, %v251_v36  ;;  %7855 = vmatpush3.msra.mxu1 %v8607_v2  ;;  %v8794_v28 = vsub.f32 %v7467_v14, %v8780_v22 }
  0x28   : > { %7856 = vmatprep.subr.mxu1 %v8609_v3  ;;  %v750_v48 = vand.u32 4294901760, %v8674_v40  ;;  %v760_v51 = vand.u32 4294901760, %v8685_v45 }
  0x29   : > { %v243_v43 = vsub.f32 %v241_v35, %v242_v38  ;;  %v253_v44 = vsub.f32 %v251_v36, %v252_v39  ;;  %7857 = vmatpush3.msra.mxu1 %v8609_v3  ;;  %7858 = vmatprep.mubr.f32.mxu1 %v242_v38  ;;  %v8810_v32 = vand.u32 4294901760, %v8794_v28 }
  0x2a   : > { %7859 = vmatmul.mubr.f32.vlgmr.msra.gmra.mxu1 %v252_v39  ;;  %7868 = vmatprep.subr.mxu1 %v8607_v2  ;;  %v751_v52 = vsub.f32 %v8674_v40, %v750_v48  ;;  %v761_v56 = vsub.f32 %v8685_v45, %v760_v51 }
  0x2b   : > { %v244_v46 = vand.u32 4294901760, %v243_v43  ;;  %v254_v47 = vand.u32 4294901760, %v253_v44  ;;  %7869 = vmatpush3.msra.mxu1 %v8607_v2  ;;  %7872 = vmatprep.mubr.f32.mxu1 %v240_v29  ;;  %v8722_v2 = vsub.f32 %v7465_v54, %v8708_v60  ;;  %v7468_v44 = vld [vmem:[%s9751_s1 + $0x40] sm:$0xff] }
  0x2c   : > { %7870 = vmatprep.subr.mxu1 %v8609_v3  ;;  %v752_v59 = vand.u32 4294901760, %v751_v52  ;;  %v762_v0 = vand.u32 4294901760, %v761_v56  ;;  %v8856_v50 = vand.u32 4294901760, %v7468_v44 }
  0x2d   : > { %7837 = vmatprep.mubr.f32.mxu0 %v244_v46  ;;  %7871 = vmatpush3.msra.mxu1 %v8609_v3  ;;  %v8726_v3 = vand.u32 4294901760, %v1192_v63 }
  0x2e   : > { %7838 = vmatmul.mubr.f32.vlgmr.msra.gmra.mxu0 %v254_v47  ;;  %7873 = vmatmul.mubr.f32.vlgmr.msra.gmra.mxu1 %v8657_v30  ;;  %v8871_v56 = vsub.f32 %v7468_v44, %v8856_v50 }
  0x2f   : > { %7848 = vmatpush3.msra.mxu0 %v8614_v5  ;;  %7851 = vmatprep.mubr.f32.mxu0 %v241_v35  ;;  %v8735_v5 = vsub.f32 %v1189_v61, %v8718_v1 }
  0x30   : > { %7849 = vmatprep.subr.mxu0 %v8617_v6  ;;  %7882 = vmatprep.subr.mxu1 %v801_v49 }
  0x31   : > { %7850 = vmatpush3.msra.mxu0 %v8617_v6  ;;  %7883 = vmatpush3.msra.mxu1 %v801_v49  ;;  %v8740_v6 = vand.u32 4294901760, %v8722_v2  ;;  %v1263_v9 = vand.u32 4294901760, %v8735_v5 }
  0x32   : > { %7861 = vmatprep.subr.mxu0 %v8621_v7  ;;  %7852 = vmatmul.mubr.f32.vlgmr.msra.gmra.mxu0 %v251_v36  ;;  %v1828_v36 = vsub.f32 %v8794_v28, %v8810_v32 }
  0x33   : > { %7862 = vmatpush3.msra.mxu0 %v8621_v7  ;;  %7865 = vmatprep.mubr.f32.mxu0 %v240_v29  ;;  %v8745_v7 = vsub.f32 %v1192_v63, %v8726_v3  ;;  %v1313_v10 = vsub.f32 %v8722_v2, %v8740_v6  ;;  %v1264_v13 = vsub.f32 %v8735_v5, %v1263_v9  ;;  %v8796_v29 = vand.u32 4294901760, %v1707_v25 }
  0x34   : > { %7863 = vmatprep.subr.mxu0 %v8625_v8  ;;  %7884 = vmatprep.subr.mxu1 %v808_v53 }
  0x35   : > { %7864 = vmatpush3.msra.mxu0 %v8625_v8  ;;  %7885 = vmatpush3.msra.mxu1 %v808_v53  ;;  %v8750_v8 = vand.u32 4294901760, %v8731_v4  ;;  %v1273_v11 = vand.u32 4294901760, %v8745_v7  ;;  %v1314_v16 = vand.u32 4294901760, %v1313_v10 }
  0x36   : > { %7875 = vmatprep.subr.mxu0 %v8643_v18  ;;  %7866 = vmatmul.mubr.f32.vlgmr.msra.gmra.mxu0 %v8657_v30 }
  0x37   : > { %7876 = vmatpush3.msra.mxu0 %v8643_v18  ;;  %7879 = vmatprep.mubr.f32.mxu0 %v752_v59  ;;  %v1320_v12 = vsub.f32 %v8731_v4, %v8750_v8  ;;  %v1274_v17 = vsub.f32 %v8745_v7, %v1273_v11 }
  0x38   : > { %7877 = vmatprep.subr.mxu0 %v8651_v21  ;;  %7886 = vmatprep.mubr.f32.mxu1 %v8659_v31 }
  0x39   : > { %7878 = vmatpush3.msra.mxu0 %v8651_v21  ;;  %7887 = vmatmul.mubr.f32.vlgmr.msra.gmra.mxu1 %v8670_v37  ;;  %v1275_v26 = vand.u32 4294901760, %v1274_v17 }
  0x3a   : > { %7889 = vmatprep.subr.mxu0 %v8649_v20  ;;  %7880 = vmatmul.mubr.f32.vlgmr.msra.gmra.mxu0 %v762_v0 }
  0x3b   : > { %7890 = vmatpush3.msra.mxu0 %v8649_v20  ;;  %7896 = vmatprep.subr.mxu1 %v8643_v18  ;;  %v1321_v20 = vand.u32 4294901760, %v1320_v12 }
  0x3c   : > { %7891 = vmatprep.subr.mxu0 %v8666_v34  ;;  %7897 = vmatpush3.msra.mxu1 %v8643_v18 }
  0x3d   : > { %7892 = vmatpush3.msra.mxu0 %v8666_v34  ;;  %7898 = vmatprep.subr.mxu1 %v8651_v21 }
  0x3e   : > { %7893 = vmatprep.mubr.f32.mxu0 %v8674_v40  ;;  %7899 = vmatpush3.msra.mxu1 %v8651_v21  ;;  %v7469_v40 = vld [vmem:[%s9751_s1 + $0x48] sm:$0xff] }
  0x3f   : > { %7900 = vmatprep.mubr.f32.mxu1 %v750_v48  ;;  %7903 = vmatprep.subr.mxu0 %v8663_v33  ;;  %v8850_v47 = vand.u32 4294901760, %v7469_v40  ;;  %v2219_v48 = vsel %vm147_vm1, %v2213_v41, 0 }
  0x40   : > { %7894 = vmatmul.mubr.f32.vlgmr.msra.gmra.mxu0 %v8685_v45  ;;  %7901 = vmatmul.mubr.f32.vlgmr.msra.gmra.mxu1 %v760_v51  ;;  %v2214_v45 = vld [vmem:[#allocation2 + $0xc] sm:$0xff]  ;;  %v8860_v53 = vand.u32 4294901760, %v2219_v48 }
  0x41   : > { %7904 = vmatpush3.msra.mxu0 %v8663_v33  ;;  %7910 = vmatprep.subr.mxu1 %v8643_v18  ;;  %v8815_v33 = vsub.f32 %v1707_v25, %v8796_v29  ;;  %v2222_v51 = vsel %vm147_vm1, %v2214_v45, 0  ;;  %v8864_v54 = vsub.f32 %v7469_v40, %v8850_v47 }
  0x42   : > { %7905 = vmatprep.subr.mxu0 %v8680_v42  ;;  %7911 = vmatpush3.msra.mxu1 %v8643_v18  ;;  %v7466_v18 = vld [vmem:[%s9751_s1 + $0x30] sm:$0xff]  ;;  %v8866_v55 = vand.u32 4294901760, %v2222_v51  ;;  %v8875_v57 = vsub.f32 %v2219_v48, %v8860_v53 }
  0x43   : > { %7906 = vmatpush3.msra.mxu0 %v8680_v42  ;;  %7912 = vmatprep.subr.mxu1 %v8651_v21  ;;  %v8786_v24 = vand.u32 4294901760, %v7466_v18  ;;  %v1829_v42 = vand.u32 4294901760, %v1828_v36  ;;  %v8880_v58 = vand.u32 4294901760, %v8864_v54 }
  0x44   : > { %7907 = vmatprep.mubr.f32.mxu0 %v8659_v31  ;;  %7913 = vmatpush3.msra.mxu1 %v8651_v21  ;;  %v1265_v21 = vand.u32 4294901760, %v1264_v13  ;;  %v8885_v59 = vsub.f32 %v2222_v51, %v8866_v55  ;;  %v2293_v61 = vand.u32 4294901760, %v8875_v57 }
  0x45   : > { %7914 = vmatprep.mubr.f32.mxu1 %v8659_v31  ;;  %7917 = vmatprep.subr.mxu0 %v8708_v60  ;;  %v8801_v30 = vsub.f32 %v7466_v18, %v8786_v24  ;;  %v8805_v31 = vsub.f32 %v1704_v23, %v8790_v27 }
  0x46   : > { %7908 = vmatmul.mubr.f32.vlgmr.msra.gmra.mxu0 %v8670_v37  ;;  %7915 = vmatmul.mubr.f32.vlgmr.msra.gmra.mxu1 %v8670_v37  ;;  %v1788_v37 = vand.u32 4294901760, %v8815_v33  ;;  %v2303_v63 = vand.u32 4294901760, %v8885_v59 }
  0x47   : > { %7918 = vmatpush3.msra.mxu0 %v8708_v60  ;;  %7924 = vmatprep.subr.mxu1 %v1314_v16  ;;  %v8820_v34 = vand.u32 4294901760, %v8801_v30  ;;  %v1778_v35 = vand.u32 4294901760, %v8805_v31 }
  0x48   : > { %7919 = vmatprep.subr.mxu0 %v8713_v62  ;;  %7925 = vmatpush3.msra.mxu1 %v1314_v16  ;;  %v1789_v43 = vsub.f32 %v8815_v33, %v1788_v37 }
  0x49   : > { %7920 = vmatpush3.msra.mxu0 %v8713_v62  ;;  %7926 = vmatprep.subr.mxu1 %v1321_v20  ;;  %v1835_v38 = vsub.f32 %v8801_v30, %v8820_v34  ;;  %v1779_v39 = vsub.f32 %v8805_v31, %v1778_v35 }
  0x4a   : > { %7921 = vmatprep.mubr.f32.mxu0 %v1265_v21  ;;  %7927 = vmatpush3.msra.mxu1 %v1321_v20  ;;  %v1790_v52 = vand.u32 4294901760, %v1789_v43 }
  0x4b   : > { %7928 = vmatprep.mubr.f32.mxu1 %v8718_v1  ;;  %7931 = vmatprep.subr.mxu0 %v8722_v2  ;;  %v1836_v46 = vand.u32 4294901760, %v1835_v38  ;;  %v1780_v49 = vand.u32 4294901760, %v1779_v39 }
  0x4c   : > { %7922 = vmatmul.mubr.f32.vlgmr.msra.gmra.mxu0 %v1275_v26  ;;  %7929 = vmatmul.mubr.f32.vlgmr.msra.gmra.mxu1 %v8726_v3 }
  0x4d   : > { %7932 = vmatpush3.msra.mxu0 %v8722_v2  ;;  %7938 = vmatprep.subr.mxu1 %v8708_v60  ;;  %v7471_v2 = vld [vmem:[%s9751_s1 + $0x58] sm:$0xff] }
  0x4e   : > { %7933 = vmatprep.subr.mxu0 %v8731_v4  ;;  %7939 = vmatpush3.msra.mxu1 %v8708_v60 }
  0x4f   : > { %7934 = vmatpush3.msra.mxu0 %v8731_v4  ;;  %7940 = vmatprep.subr.mxu1 %v8713_v62 }
  0x50   : > { %7935 = vmatprep.mubr.f32.mxu0 %v8735_v5  ;;  %7941 = vmatpush3.msra.mxu1 %v8713_v62  ;;  %v2304_v5 = vsub.f32 %v8885_v59, %v2303_v63 }
  0x51   : > { %7942 = vmatprep.mubr.f32.mxu1 %v1263_v9  ;;  %7945 = vmatprep.subr.mxu0 %v8740_v6  ;;  %v8920_v9 = vand.u32 4294901760, %v7471_v2 }
  0x52   : > { %7936 = vmatmul.mubr.f32.vlgmr.msra.gmra.mxu0 %v8745_v7  ;;  %7943 = vmatmul.mubr.f32.vlgmr.msra.gmra.mxu1 %v1273_v11  ;;  %v2729_v7 = vld [vmem:[#allocation2 + $0xd] sm:$0xff]  ;;  %v2305_v14 = vand.u32 4294901760, %v2304_v5 }
  0x53   : > { %7946 = vmatpush3.msra.mxu0 %v8740_v6  ;;  %7952 = vmatprep.subr.mxu1 %v8708_v60  ;;  %v7470_v6 = vld [vmem:[%s9751_s1 + $0x50] sm:$0xff]  ;;  %v2737_v13 = vsel %vm147_vm1, %v2729_v7, 0  ;;  %v8934_v16 = vsub.f32 %v7471_v2, %v8920_v9 }
  0x54   : > { %7947 = vmatprep.subr.mxu0 %v8750_v8  ;;  %7953 = vmatpush3.msra.mxu1 %v8708_v60  ;;  %v8890_v60 = vand.u32 4294901760, %v8871_v56  ;;  %v8926_v12 = vand.u32 4294901760, %v7470_v6  ;;  %v8936_v17 = vand.u32 4294901760, %v2737_v13 }
  0x55   : > { %7948 = vmatpush3.msra.mxu0 %v8750_v8  ;;  %7954 = vmatprep.subr.mxu1 %v8713_v62  ;;  %v8950_v20 = vand.u32 4294901760, %v8934_v16 }
  0x56   : > { %7949 = vmatprep.mubr.f32.mxu0 %v8718_v1  ;;  %7955 = vmatpush3.msra.mxu1 %v8713_v62  ;;  %v2343_v62 = vsub.f32 %v8864_v54, %v8880_v58  ;;  %v2350_v0 = vsub.f32 %v8871_v56, %v8890_v60  ;;  %v8941_v18 = vsub.f32 %v7470_v6, %v8926_v12 }
  0x57   : > { %7956 = vmatprep.mubr.f32.mxu1 %v8718_v1  ;;  %7959 = vmatprep.subr.mxu0 %v8780_v22  ;;  %v2294_v1 = vsub.f32 %v8875_v57, %v2293_v61 }
  0x58   : > { %7950 = vmatmul.mubr.f32.vlgmr.msra.gmra.mxu0 %v8726_v3  ;;  %7957 = vmatmul.mubr.f32.vlgmr.msra.gmra.mxu1 %v8726_v3  ;;  %v2728_v3 = vld [vmem:[#allocation2 + $0x5] sm:$0xff]  ;;  %v2344_v4 = vand.u32 4294901760, %v2343_v62  ;;  %v2351_v8 = vand.u32 4294901760, %v2350_v0  ;;  %v8960_v23 = vand.u32 4294901760, %v8941_v18 }
  0x59   : > { %7960 = vmatpush3.msra.mxu0 %v8780_v22  ;;  %7966 = vmatprep.subr.mxu1 %v1829_v42  ;;  %v2734_v10 = vsel %vm147_vm1, %v2728_v3, 0  ;;  %v2295_v11 = vand.u32 4294901760, %v2294_v1 }
  0x5a   : > { %7961 = vmatprep.subr.mxu0 %v8786_v24  ;;  %7967 = vmatpush3.msra.mxu1 %v1829_v42  ;;  %v8930_v15 = vand.u32 4294901760, %v2734_v10  ;;  %v2865_v26 = vsub.f32 %v8941_v18, %v8960_v23 }
  0x5b   : > { %7962 = vmatpush3.msra.mxu0 %v8786_v24  ;;  %7968 = vmatprep.subr.mxu1 %v1836_v46 }
  0x5c   : > { %7963 = vmatprep.mubr.f32.mxu0 %v1780_v49  ;;  %7969 = vmatpush3.msra.mxu1 %v1836_v46  ;;  %v8945_v19 = vsub.f32 %v2734_v10, %v8930_v15 }
  0x5d   : > { %7970 = vmatprep.mubr.f32.mxu1 %v8790_v27  ;;  %7973 = vmatprep.subr.mxu0 %v8794_v28 }
  0x5e   : > { %7964 = vmatmul.mubr.f32.vlgmr.msra.gmra.mxu0 %v1790_v52  ;;  %7971 = vmatmul.mubr.f32.vlgmr.msra.gmra.mxu1 %v8796_v29  ;;  %v2808_v21 = vand.u32 4294901760, %v8945_v19 }
  0x5f   : > { %7974 = vmatpush3.msra.mxu0 %v8794_v28  ;;  %7980 = vmatprep.subr.mxu1 %v8780_v22  ;;  %v7473_v28 = vld [vmem:[%s9751_s1 + $0x68] sm:$0xff] }
  0x60   : > { %7975 = vmatprep.subr.mxu0 %v8801_v30  ;;  %7981 = vmatpush3.msra.mxu1 %v8780_v22 }
  0x61   : > { %7976 = vmatpush3.msra.mxu0 %v8801_v30  ;;  %7982 = vmatprep.subr.mxu1 %v8786_v24 }
  0x62   : > { %7977 = vmatprep.mubr.f32.mxu0 %v8805_v31  ;;  %7983 = vmatpush3.msra.mxu1 %v8786_v24 }
  0x63   : > { %7984 = vmatprep.mubr.f32.mxu1 %v1778_v35  ;;  %7987 = vmatprep.subr.mxu0 %v8810_v32  ;;  %v8990_v35 = vand.u32 4294901760, %v7473_v28 }
  0x64   : > { %7978 = vmatmul.mubr.f32.vlgmr.msra.gmra.mxu0 %v8815_v33  ;;  %7985 = vmatmul.mubr.f32.vlgmr.msra.gmra.mxu1 %v1788_v37  ;;  %v3244_v33 = vld [vmem:[#allocation2 + $0xe] sm:$0xff] }
  0x65   : > { %7988 = vmatpush3.msra.mxu0 %v8810_v32  ;;  %7994 = vmatprep.subr.mxu1 %v8780_v22  ;;  %v7472_v32 = vld [vmem:[%s9751_s1 + $0x60] sm:$0xff]  ;;  %v3252_v39 = vsel %vm147_vm1, %v3244_v33, 0  ;;  %v9004_v42 = vsub.f32 %v7473_v28, %v8990_v35 }
  0x66   : > { %7989 = vmatprep.subr.mxu0 %v8820_v34  ;;  %7995 = vmatpush3.msra.mxu1 %v8780_v22  ;;  %v8955_v22 = vsub.f32 %v2737_v13, %v8936_v17  ;;  %v8996_v38 = vand.u32 4294901760, %v7472_v32  ;;  %v9006_v43 = vand.u32 4294901760, %v3252_v39 }
  0x67   : > { %7990 = vmatpush3.msra.mxu0 %v8820_v34  ;;  %7996 = vmatprep.subr.mxu1 %v8786_v24  ;;  %v2866_v34 = vand.u32 4294901760, %v2865_v26  ;;  %v9020_v46 = vand.u32 4294901760, %v9004_v42 }
  0x68   : > { %7991 = vmatprep.mubr.f32.mxu0 %v8790_v27  ;;  %7997 = vmatpush3.msra.mxu1 %v8786_v24  ;;  %v2858_v24 = vsub.f32 %v8934_v16, %v8950_v20  ;;  %v2818_v25 = vand.u32 4294901760, %v8955_v22  ;;  %v9011_v44 = vsub.f32 %v7472_v32, %v8996_v38 }
  0x69   : > { %7998 = vmatprep.mubr.f32.mxu1 %v8790_v27  ;;  %8001 = vmatprep.subr.mxu0 %v8850_v47  ;;  %v2809_v27 = vsub.f32 %v8945_v19, %v2808_v21 }
  0x6a   : > { %7992 = vmatmul.mubr.f32.vlgmr.msra.gmra.mxu0 %v8796_v29  ;;  %7999 = vmatmul.mubr.f32.vlgmr.msra.gmra.mxu1 %v8796_v29  ;;  %v3243_v29 = vld [vmem:[#allocation2 + $0x6] sm:$0xff]  ;;  %v2859_v30 = vand.u32 4294901760, %v2858_v24  ;;  %v2819_v31 = vsub.f32 %v8955_v22, %v2818_v25  ;;  %v9030_v48 = vand.u32 4294901760, %v9011_v44 }
  0x6b   : > { %8002 = vmatpush3.msra.mxu0 %v8850_v47  ;;  %8008 = vmatprep.subr.mxu1 %v2344_v4  ;;  %v3249_v36 = vsel %vm147_vm1, %v3243_v29, 0  ;;  %v2810_v37 = vand.u32 4294901760, %v2809_v27 }
  0x6c   : > { %8003 = vmatprep.subr.mxu0 %v8856_v50  ;;  %8009 = vmatpush3.msra.mxu1 %v2344_v4  ;;  %v2820_v40 = vand.u32 4294901760, %v2819_v31  ;;  %v9000_v41 = vand.u32 4294901760, %v3249_v36  ;;  %v3380_v52 = vsub.f32 %v9011_v44, %v9030_v48 }
  0x6d   : > { %8004 = vmatpush3.msra.mxu0 %v8856_v50  ;;  %8010 = vmatprep.subr.mxu1 %v2351_v8 }
  0x6e   : > { %8005 = vmatprep.mubr.f32.mxu0 %v2295_v11  ;;  %8011 = vmatpush3.msra.mxu1 %v2351_v8  ;;  %v9015_v45 = vsub.f32 %v3249_v36, %v9000_v41 }
  0x6f   : > { %8012 = vmatprep.mubr.f32.mxu1 %v8860_v53  ;;  %8015 = vmatprep.subr.mxu0 %v8864_v54 }
  0x70   : > { %8006 = vmatmul.mubr.f32.vlgmr.msra.gmra.mxu0 %v2305_v14  ;;  %8013 = vmatmul.mubr.f32.vlgmr.msra.gmra.mxu1 %v8866_v55  ;;  %v3323_v49 = vand.u32 4294901760, %v9015_v45 }
  0x71   : > { %8016 = vmatpush3.msra.mxu0 %v8864_v54  ;;  %8022 = vmatprep.subr.mxu1 %v8850_v47  ;;  %v7475_v54 = vld [vmem:[%s9751_s1 + $0x78] sm:$0xff] }
  0x72   : > { %8017 = vmatprep.subr.mxu0 %v8871_v56  ;;  %8023 = vmatpush3.msra.mxu1 %v8850_v47 }
  0x73   : > { %8018 = vmatpush3.msra.mxu0 %v8871_v56  ;;  %8024 = vmatprep.subr.mxu1 %v8856_v50 }
  0x74   : > { %8019 = vmatprep.mubr.f32.mxu0 %v8875_v57  ;;  %8025 = vmatpush3.msra.mxu1 %v8856_v50 }
  0x75   : > { %8026 = vmatprep.mubr.f32.mxu1 %v2293_v61  ;;  %8029 = vmatprep.subr.mxu0 %v8880_v58  ;;  %v9060_v61 = vand.u32 4294901760, %v7475_v54 }
  0x76   : > { %8020 = vmatmul.mubr.f32.vlgmr.msra.gmra.mxu0 %v8885_v59  ;;  %8027 = vmatmul.mubr.f32.vlgmr.msra.gmra.mxu1 %v2303_v63  ;;  %v3759_v59 = vld [vmem:[#allocation2 + $0x20] sm:$0xff] }
  0x77   : > { %8030 = vmatpush3.msra.mxu0 %v8880_v58  ;;  %8036 = vmatprep.subr.mxu1 %v8850_v47  ;;  %v7474_v58 = vld [vmem:[%s9751_s1 + $0x70] sm:$0xff]  ;;  %v3767_v1 = vsel %vm147_vm1, %v3759_v59, 0  ;;  %v9074_v4 = vsub.f32 %v7475_v54, %v9060_v61 }
  0x78   : > { %8031 = vmatprep.subr.mxu0 %v8890_v60  ;;  %8037 = vmatpush3.msra.mxu1 %v8850_v47  ;;  %v9025_v47 = vsub.f32 %v3252_v39, %v9006_v43  ;;  %v9066_v0 = vand.u32 4294901760, %v7474_v58  ;;  %v9076_v5 = vand.u32 4294901760, %v3767_v1 }
  0x79   : > { %8032 = vmatpush3.msra.mxu0 %v8890_v60  ;;  %8038 = vmatprep.subr.mxu1 %v8856_v50  ;;  %v3381_v60 = vand.u32 4294901760, %v3380_v52  ;;  %v9090_v8 = vand.u32 4294901760, %v9074_v4 }
  0x7a   : > { %8033 = vmatprep.mubr.f32.mxu0 %v8860_v53  ;;  %8039 = vmatpush3.msra.mxu1 %v8856_v50  ;;  %v3373_v50 = vsub.f32 %v9004_v42, %v9020_v46  ;;  %v3333_v51 = vand.u32 4294901760, %v9025_v47  ;;  %v9081_v6 = vsub.f32 %v7474_v58, %v9066_v0 }
  0x7b   : > { %8040 = vmatprep.mubr.f32.mxu1 %v8860_v53  ;;  %8043 = vmatprep.subr.mxu0 %v8920_v9  ;;  %v3324_v53 = vsub.f32 %v9015_v45, %v3323_v49 }
  0x7c   : > { %8034 = vmatmul.mubr.f32.vlgmr.msra.gmra.mxu0 %v8866_v55  ;;  %8041 = vmatmul.mubr.f32.vlgmr.msra.gmra.mxu1 %v8866_v55  ;;  %v3758_v55 = vld [vmem:[#allocation2 + $0x18] sm:$0xff]  ;;  %v3374_v56 = vand.u32 4294901760, %v3373_v50  ;;  %v3334_v57 = vsub.f32 %v9025_v47, %v3333_v51  ;;  %v9100_v10 = vand.u32 4294901760, %v9081_v6 }
  0x7d   : > { %8044 = vmatpush3.msra.mxu0 %v8920_v9  ;;  %8050 = vmatprep.subr.mxu1 %v2859_v30  ;;  %v3764_v62 = vsel %vm147_vm1, %v3758_v55, 0  ;;  %v3325_v63 = vand.u32 4294901760, %v3324_v53 }
  0x7e   : > { %8045 = vmatprep.subr.mxu0 %v8926_v12  ;;  %8051 = vmatpush3.msra.mxu1 %v2859_v30  ;;  %v3335_v2 = vand.u32 4294901760, %v3334_v57  ;;  %v9070_v3 = vand.u32 4294901760, %v3764_v62  ;;  %v3895_v14 = vsub.f32 %v9081_v6, %v9100_v10 }
  0x7f   : > { %8046 = vmatpush3.msra.mxu0 %v8926_v12  ;;  %8052 = vmatprep.subr.mxu1 %v2866_v34 }
  0x80   : > { %8047 = vmatprep.mubr.f32.mxu0 %v2810_v37  ;;  %8053 = vmatpush3.msra.mxu1 %v2866_v34  ;;  %v9085_v7 = vsub.f32 %v3764_v62, %v9070_v3 }
  0x81   : > { %8054 = vmatprep.mubr.f32.mxu1 %v8930_v15  ;;  %8057 = vmatprep.subr.mxu0 %v8934_v16 }
  0x82   : > { %8048 = vmatmul.mubr.f32.vlgmr.msra.gmra.mxu0 %v2820_v40  ;;  %8055 = vmatmul.mubr.f32.vlgmr.msra.gmra.mxu1 %v8936_v17  ;;  %v3838_v11 = vand.u32 4294901760, %v9085_v7 }
  0x83   : > { %8058 = vmatpush3.msra.mxu0 %v8934_v16  ;;  %8064 = vmatprep.subr.mxu1 %v8920_v9  ;;  %v7477_v16 = vld [vmem:[%s9751_s1 + $0x88] sm:$0xff] }
  0x84   : > { %8059 = vmatprep.subr.mxu0 %v8941_v18  ;;  %8065 = vmatpush3.msra.mxu1 %v8920_v9 }
  0x85   : > { %8060 = vmatpush3.msra.mxu0 %v8941_v18  ;;  %8066 = vmatprep.subr.mxu1 %v8926_v12 }
  0x86   : > { %8061 = vmatprep.mubr.f32.mxu0 %v8945_v19  ;;  %8067 = vmatpush3.msra.mxu1 %v8926_v12 }
  0x87   : > { %8068 = vmatprep.mubr.f32.mxu1 %v2808_v21  ;;  %8071 = vmatprep.subr.mxu0 %v8950_v20  ;;  %v9130_v21 = vand.u32 4294901760, %v7477_v16 }
  0x88   : > { %8062 = vmatmul.mubr.f32.vlgmr.msra.gmra.mxu0 %v8955_v22  ;;  %8069 = vmatmul.mubr.f32.vlgmr.msra.gmra.mxu1 %v2818_v25  ;;  %v4274_v22 = vld [vmem:[#allocation2 + $0x21] sm:$0xff] }
  0x89   : > { %8072 = vmatpush3.msra.mxu0 %v8950_v20  ;;  %8078 = vmatprep.subr.mxu1 %v8920_v9  ;;  %v7476_v20 = vld [vmem:[%s9751_s1 + $0x80] sm:$0xff]  ;;  %v4282_v27 = vsel %vm147_vm1, %v4274_v22, 0  ;;  %v9144_v30 = vsub.f32 %v7477_v16, %v9130_v21 }
  0x8a   : > { %8073 = vmatprep.subr.mxu0 %v8960_v23  ;;  %8079 = vmatpush3.msra.mxu1 %v8920_v9  ;;  %v9095_v9 = vsub.f32 %v3767_v1, %v9076_v5  ;;  %v9136_v26 = vand.u32 4294901760, %v7476_v20  ;;  %v9146_v31 = vand.u32 4294901760, %v4282_v27 }
  0x8b   : > { %8074 = vmatpush3.msra.mxu0 %v8960_v23  ;;  %8080 = vmatprep.subr.mxu1 %v8926_v12  ;;  %v3896_v23 = vand.u32 4294901760, %v3895_v14  ;;  %v9160_v34 = vand.u32 4294901760, %v9144_v30 }
  0x8c   : > { %8075 = vmatprep.mubr.f32.mxu0 %v8930_v15  ;;  %8081 = vmatpush3.msra.mxu1 %v8926_v12  ;;  %v3888_v12 = vsub.f32 %v9074_v4, %v9090_v8  ;;  %v3848_v13 = vand.u32 4294901760, %v9095_v9  ;;  %v9151_v32 = vsub.f32 %v7476_v20, %v9136_v26 }
  0x8d   : > { %8082 = vmatprep.mubr.f32.mxu1 %v8930_v15  ;;  %8085 = vmatprep.subr.mxu0 %v8990_v35  ;;  %v3839_v15 = vsub.f32 %v9085_v7, %v3838_v11 }
  0x8e   : > { %8076 = vmatmul.mubr.f32.vlgmr.msra.gmra.mxu0 %v8936_v17  ;;  %8083 = vmatmul.mubr.f32.vlgmr.msra.gmra.mxu1 %v8936_v17  ;;  %v4273_v17 = vld [vmem:[#allocation2 + $0x19] sm:$0xff]  ;;  %v3889_v18 = vand.u32 4294901760, %v3888_v12  ;;  %v3849_v19 = vsub.f32 %v9095_v9, %v3848_v13  ;;  %v9170_v36 = vand.u32 4294901760, %v9151_v32 }
  0x8f   : > { %8086 = vmatpush3.msra.mxu0 %v8990_v35  ;;  %8092 = vmatprep.subr.mxu1 %v3374_v56  ;;  %v4279_v24 = vsel %vm147_vm1, %v4273_v17, 0  ;;  %v3840_v25 = vand.u32 4294901760, %v3839_v15 }
  0x90   : > { %8087 = vmatprep.subr.mxu0 %v8996_v38  ;;  %8093 = vmatpush3.msra.mxu1 %v3374_v56  ;;  %v3850_v28 = vand.u32 4294901760, %v3849_v19  ;;  %v9140_v29 = vand.u32 4294901760, %v4279_v24  ;;  %v4410_v40 = vsub.f32 %v9151_v32, %v9170_v36 }
  0x91   : > { %8088 = vmatpush3.msra.mxu0 %v8996_v38  ;;  %8094 = vmatprep.subr.mxu1 %v3381_v60 }
  0x92   : > { %8089 = vmatprep.mubr.f32.mxu0 %v3325_v63  ;;  %8095 = vmatpush3.msra.mxu1 %v3381_v60  ;;  %v9155_v33 = vsub.f32 %v4279_v24, %v9140_v29 }
  0x93   : > { %8096 = vmatprep.mubr.f32.mxu1 %v9000_v41  ;;  %8099 = vmatprep.subr.mxu0 %v9004_v42 }
  0x94   : > { %8090 = vmatmul.mubr.f32.vlgmr.msra.gmra.mxu0 %v3335_v2  ;;  %8097 = vmatmul.mubr.f32.vlgmr.msra.gmra.mxu1 %v9006_v43  ;;  %v4353_v37 = vand.u32 4294901760, %v9155_v33 }
  0x95   : > { %8100 = vmatpush3.msra.mxu0 %v9004_v42  ;;  %8106 = vmatprep.subr.mxu1 %v8990_v35  ;;  %v7479_v42 = vld [vmem:[%s9751_s1 + $0x98] sm:$0xff] }
  0x96   : > { %8101 = vmatprep.subr.mxu0 %v9011_v44  ;;  %8107 = vmatpush3.msra.mxu1 %v8990_v35 }
  0x97   : > { %8102 = vmatpush3.msra.mxu0 %v9011_v44  ;;  %8108 = vmatprep.subr.mxu1 %v8996_v38 }
  0x98   : > { %8103 = vmatprep.mubr.f32.mxu0 %v9015_v45  ;;  %8109 = vmatpush3.msra.mxu1 %v8996_v38 }
  0x99   : > { %8110 = vmatprep.mubr.f32.mxu1 %v3323_v49  ;;  %8113 = vmatprep.subr.mxu0 %v9020_v46  ;;  %v9200_v49 = vand.u32 4294901760, %v7479_v42 }
  0x9a   : > { %8104 = vmatmul.mubr.f32.vlgmr.msra.gmra.mxu0 %v9025_v47  ;;  %8111 = vmatmul.mubr.f32.vlgmr.msra.gmra.mxu1 %v3333_v51  ;;  %v4789_v47 = vld [vmem:[#allocation2 + $0x22] sm:$0xff] }
  0x9b   : > { %8114 = vmatpush3.msra.mxu0 %v9020_v46  ;;  %8120 = vmatprep.subr.mxu1 %v8990_v35  ;;  %v7478_v46 = vld [vmem:[%s9751_s1 + $0x90] sm:$0xff]  ;;  %v4797_v53 = vsel %vm147_vm1, %v4789_v47, 0  ;;  %v9214_v56 = vsub.f32 %v7479_v42, %v9200_v49 }
  0x9c   : > { %8115 = vmatprep.subr.mxu0 %v9030_v48  ;;  %8121 = vmatpush3.msra.mxu1 %v8990_v35  ;;  %v9165_v35 = vsub.f32 %v4282_v27, %v9146_v31  ;;  %v9206_v52 = vand.u32 4294901760, %v7478_v46  ;;  %v9216_v57 = vand.u32 4294901760, %v4797_v53 }
  0x9d   : > { %8116 = vmatpush3.msra.mxu0 %v9030_v48  ;;  %8122 = vmatprep.subr.mxu1 %v8996_v38  ;;  %v4411_v48 = vand.u32 4294901760, %v4410_v40  ;;  %v9230_v60 = vand.u32 4294901760, %v9214_v56 }
  0x9e   : > { %8117 = vmatprep.mubr.f32.mxu0 %v9000_v41  ;;  %8123 = vmatpush3.msra.mxu1 %v8996_v38  ;;  %v4403_v38 = vsub.f32 %v9144_v30, %v9160_v34  ;;  %v4363_v39 = vand.u32 4294901760, %v9165_v35  ;;  %v9221_v58 = vsub.f32 %v7478_v46, %v9206_v52 }
  0x9f   : > { %8124 = vmatprep.mubr.f32.mxu1 %v9000_v41  ;;  %8127 = vmatprep.subr.mxu0 %v9060_v61  ;;  %v4354_v41 = vsub.f32 %v9155_v33, %v4353_v37 }
  0xa0   : > { %8118 = vmatmul.mubr.f32.vlgmr.msra.gmra.mxu0 %v9006_v43  ;;  %8125 = vmatmul.mubr.f32.vlgmr.msra.gmra.mxu1 %v9006_v43  ;;  %v4788_v43 = vld [vmem:[#allocation2 + $0x1a] sm:$0xff]  ;;  %v4404_v44 = vand.u32 4294901760, %v4403_v38  ;;  %v4364_v45 = vsub.f32 %v9165_v35, %v4363_v39  ;;  %v9240_v62 = vand.u32 4294901760, %v9221_v58 }
  0xa1   : > { %8128 = vmatpush3.msra.mxu0 %v9060_v61  ;;  %8134 = vmatprep.subr.mxu1 %v3889_v18  ;;  %v4794_v50 = vsel %vm147_vm1, %v4788_v43, 0  ;;  %v4355_v51 = vand.u32 4294901760, %v4354_v41 }
  0xa2   : > { %8129 = vmatprep.subr.mxu0 %v9066_v0  ;;  %8135 = vmatpush3.msra.mxu1 %v3889_v18  ;;  %v4365_v54 = vand.u32 4294901760, %v4364_v45  ;;  %v9210_v55 = vand.u32 4294901760, %v4794_v50  ;;  %v4925_v2 = vsub.f32 %v9221_v58, %v9240_v62 }
  0xa3   : > { %8130 = vmatpush3.msra.mxu0 %v9066_v0  ;;  %8136 = vmatprep.subr.mxu1 %v3896_v23 }
  0xa4   : > { %8131 = vmatprep.mubr.f32.mxu0 %v3840_v25  ;;  %8137 = vmatpush3.msra.mxu1 %v3896_v23  ;;  %v9225_v59 = vsub.f32 %v4794_v50, %v9210_v55 }
  0xa5   : > { %8138 = vmatprep.mubr.f32.mxu1 %v9070_v3  ;;  %8141 = vmatprep.subr.mxu0 %v9074_v4 }
  0xa6   : > { %8132 = vmatmul.mubr.f32.vlgmr.msra.gmra.mxu0 %v3850_v28  ;;  %8139 = vmatmul.mubr.f32.vlgmr.msra.gmra.mxu1 %v9076_v5  ;;  %v4868_v63 = vand.u32 4294901760, %v9225_v59 }
  0xa7   : > { %8142 = vmatpush3.msra.mxu0 %v9074_v4  ;;  %8148 = vmatprep.subr.mxu1 %v9060_v61  ;;  %v7481_v4 = vld [vmem:[%s9751_s1 + $0xa8] sm:$0xff] }
  0xa8   : > { %8143 = vmatprep.subr.mxu0 %v9081_v6  ;;  %8149 = vmatpush3.msra.mxu1 %v9060_v61 }
  0xa9   : > { %8144 = vmatpush3.msra.mxu0 %v9081_v6  ;;  %8150 = vmatprep.subr.mxu1 %v9066_v0 }
  0xaa   : > { %8145 = vmatprep.mubr.f32.mxu0 %v9085_v7  ;;  %8151 = vmatpush3.msra.mxu1 %v9066_v0 }
  0xab   : > { %8152 = vmatprep.mubr.f32.mxu1 %v3838_v11  ;;  %8155 = vmatprep.subr.mxu0 %v9090_v8  ;;  %v9270_v11 = vand.u32 4294901760, %v7481_v4 }
  0xac   : > { %8146 = vmatmul.mubr.f32.vlgmr.msra.gmra.mxu0 %v9095_v9  ;;  %8153 = vmatmul.mubr.f32.vlgmr.msra.gmra.mxu1 %v3848_v13  ;;  %v5304_v9 = vld [vmem:[#allocation2 + $0x23] sm:$0xff] }
  0xad   : > { %8156 = vmatpush3.msra.mxu0 %v9090_v8  ;;  %8162 = vmatprep.subr.mxu1 %v9060_v61  ;;  %v7480_v8 = vld [vmem:[%s9751_s1 + $0xa0] sm:$0xff]  ;;  %v5312_v15 = vsel %vm147_vm1, %v5304_v9, 0  ;;  %v9284_v18 = vsub.f32 %v7481_v4, %v9270_v11 }
  0xae   : > { %8157 = vmatprep.subr.mxu0 %v9100_v10  ;;  %8163 = vmatpush3.msra.mxu1 %v9060_v61  ;;  %v9235_v61 = vsub.f32 %v4797_v53, %v9216_v57  ;;  %v9276_v14 = vand.u32 4294901760, %v7480_v8  ;;  %v9286_v19 = vand.u32 4294901760, %v5312_v15 }
  0xaf   : > { %8158 = vmatpush3.msra.mxu0 %v9100_v10  ;;  %8164 = vmatprep.subr.mxu1 %v9066_v0  ;;  %v4926_v10 = vand.u32 4294901760, %v4925_v2  ;;  %v9300_v23 = vand.u32 4294901760, %v9284_v18 }
  0xb0   : > { %8159 = vmatprep.mubr.f32.mxu0 %v9070_v3  ;;  %8165 = vmatpush3.msra.mxu1 %v9066_v0  ;;  %v4918_v0 = vsub.f32 %v9214_v56, %v9230_v60  ;;  %v4878_v1 = vand.u32 4294901760, %v9235_v61  ;;  %v9291_v20 = vsub.f32 %v7480_v8, %v9276_v14 }
  0xb1   : > { %8166 = vmatprep.mubr.f32.mxu1 %v9070_v3  ;;  %8169 = vmatprep.subr.mxu0 %v9130_v21  ;;  %v4869_v3 = vsub.f32 %v9225_v59, %v4868_v63 }
  0xb2   : > { %8160 = vmatmul.mubr.f32.vlgmr.msra.gmra.mxu0 %v9076_v5  ;;  %8167 = vmatmul.mubr.f32.vlgmr.msra.gmra.mxu1 %v9076_v5  ;;  %v5303_v5 = vld [vmem:[#allocation2 + $0x1b] sm:$0xff]  ;;  %v4919_v6 = vand.u32 4294901760, %v4918_v0  ;;  %v4879_v7 = vsub.f32 %v9235_v61, %v4878_v1  ;;  %v9310_v24 = vand.u32 4294901760, %v9291_v20 }
  0xb3   : > { %8170 = vmatpush3.msra.mxu0 %v9130_v21  ;;  %8176 = vmatprep.subr.mxu1 %v4404_v44  ;;  %v5309_v12 = vsel %vm147_vm1, %v5303_v5, 0  ;;  %v4870_v13 = vand.u32 4294901760, %v4869_v3 }
  0xb4   : > { %8171 = vmatprep.subr.mxu0 %v9136_v26  ;;  %8177 = vmatpush3.msra.mxu1 %v4404_v44  ;;  %v4880_v16 = vand.u32 4294901760, %v4879_v7  ;;  %v9280_v17 = vand.u32 4294901760, %v5309_v12  ;;  %v5440_v28 = vsub.f32 %v9291_v20, %v9310_v24 }
  0xb5   : > { %8172 = vmatpush3.msra.mxu0 %v9136_v26  ;;  %8178 = vmatprep.subr.mxu1 %v4411_v48 }
  0xb6   : > { %8173 = vmatprep.mubr.f32.mxu0 %v4355_v51  ;;  %8179 = vmatpush3.msra.mxu1 %v4411_v48  ;;  %v9295_v22 = vsub.f32 %v5309_v12, %v9280_v17 }
  0xb7   : > { %8180 = vmatprep.mubr.f32.mxu1 %v9140_v29  ;;  %8183 = vmatprep.subr.mxu0 %v9144_v30 }
  0xb8   : > { %8174 = vmatmul.mubr.f32.vlgmr.msra.gmra.mxu0 %v4365_v54  ;;  %8181 = vmatmul.mubr.f32.vlgmr.msra.gmra.mxu1 %v9146_v31  ;;  %v5383_v25 = vand.u32 4294901760, %v9295_v22 }
  0xb9   : > { %8184 = vmatpush3.msra.mxu0 %v9144_v30  ;;  %8190 = vmatprep.subr.mxu1 %v9130_v21  ;;  %v7483_v30 = vld [vmem:[%s9751_s1 + $0xb8] sm:$0xff] }
  0xba   : > { %8185 = vmatprep.subr.mxu0 %v9151_v32  ;;  %8191 = vmatpush3.msra.mxu1 %v9130_v21 }
  0xbb   : > { %8186 = vmatpush3.msra.mxu0 %v9151_v32  ;;  %8192 = vmatprep.subr.mxu1 %v9136_v26 }
  0xbc   : > { %8187 = vmatprep.mubr.f32.mxu0 %v9155_v33  ;;  %8193 = vmatpush3.msra.mxu1 %v9136_v26 }
  0xbd   : > { %8194 = vmatprep.mubr.f32.mxu1 %v4353_v37  ;;  %8197 = vmatprep.subr.mxu0 %v9160_v34  ;;  %v9340_v37 = vand.u32 4294901760, %v7483_v30 }
  0xbe   : > { %8188 = vmatmul.mubr.f32.vlgmr.msra.gmra.mxu0 %v9165_v35  ;;  %8195 = vmatmul.mubr.f32.vlgmr.msra.gmra.mxu1 %v4363_v39  ;;  %v5819_v35 = vld [vmem:[#allocation2 + $0x24] sm:$0xff] }
  0xbf   : > { %8198 = vmatpush3.msra.mxu0 %v9160_v34  ;;  %8204 = vmatprep.subr.mxu1 %v9130_v21  ;;  %v7482_v34 = vld [vmem:[%s9751_s1 + $0xb0] sm:$0xff]  ;;  %v5827_v41 = vsel %vm147_vm1, %v5819_v35, 0  ;;  %v9354_v44 = vsub.f32 %v7483_v30, %v9340_v37 }
  0xc0   : > { %8199 = vmatprep.subr.mxu0 %v9170_v36  ;;  %8205 = vmatpush3.msra.mxu1 %v9130_v21  ;;  %v9305_v21 = vsub.f32 %v5312_v15, %v9286_v19  ;;  %v9346_v40 = vand.u32 4294901760, %v7482_v34  ;;  %v9356_v45 = vand.u32 4294901760, %v5827_v41 }
  0xc1   : > { %8200 = vmatpush3.msra.mxu0 %v9170_v36  ;;  %8206 = vmatprep.subr.mxu1 %v9136_v26  ;;  %v5441_v36 = vand.u32 4294901760, %v5440_v28  ;;  %v9370_v48 = vand.u32 4294901760, %v9354_v44 }
  0xc2   : > { %8201 = vmatprep.mubr.f32.mxu0 %v9140_v29  ;;  %8207 = vmatpush3.msra.mxu1 %v9136_v26  ;;  %v5433_v26 = vsub.f32 %v9284_v18, %v9300_v23  ;;  %v5393_v27 = vand.u32 4294901760, %v9305_v21  ;;  %v9361_v46 = vsub.f32 %v7482_v34, %v9346_v40  ;;  %v6848_v34 = vld [vmem:[#allocation2 + $0x1e] sm:$0xff] }
  0xc3   : > { %8208 = vmatprep.mubr.f32.mxu1 %v9140_v29  ;;  %8211 = vmatprep.subr.mxu0 %v9200_v49  ;;  %v5384_v29 = vsub.f32 %v9295_v22, %v5383_v25 }
  0xc4   : > { %8202 = vmatmul.mubr.f32.vlgmr.msra.gmra.mxu0 %v9146_v31  ;;  %8209 = vmatmul.mubr.f32.vlgmr.msra.gmra.mxu1 %v9146_v31  ;;  %v5818_v31 = vld [vmem:[#allocation2 + $0x1c] sm:$0xff]  ;;  %v5434_v32 = vand.u32 4294901760, %v5433_v26  ;;  %v5394_v33 = vsub.f32 %v9305_v21, %v5393_v27  ;;  %v9380_v50 = vand.u32 4294901760, %v9361_v46 }
  0xc5   : > { %8212 = vmatpush3.msra.mxu0 %v9200_v49  ;;  %8218 = vmatprep.subr.mxu1 %v4919_v6  ;;  %v5824_v38 = vsel %vm147_vm1, %v5818_v31, 0  ;;  %v5385_v39 = vand.u32 4294901760, %v5384_v29 }
  0xc6   : > { %8213 = vmatprep.subr.mxu0 %v9206_v52  ;;  %8219 = vmatpush3.msra.mxu1 %v4919_v6  ;;  %v5395_v42 = vand.u32 4294901760, %v5394_v33  ;;  %v9350_v43 = vand.u32 4294901760, %v5824_v38  ;;  %v5955_v54 = vsub.f32 %v9361_v46, %v9380_v50  ;;  %v7487_v33 = vld [vmem:[%s9751_s1 + $0xd8] sm:$0xff] }
  0xc7   : > { %8214 = vmatpush3.msra.mxu0 %v9206_v52  ;;  %8220 = vmatprep.subr.mxu1 %v4926_v10 }
  0xc8   : > { %8215 = vmatprep.mubr.f32.mxu0 %v4870_v13  ;;  %8221 = vmatpush3.msra.mxu1 %v4926_v10  ;;  %v9365_v47 = vsub.f32 %v5824_v38, %v9350_v43 }
  0xc9   : > { %8222 = vmatprep.mubr.f32.mxu1 %v9210_v55  ;;  %8225 = vmatprep.subr.mxu0 %v9214_v56 }
  0xca   : > { %8216 = vmatmul.mubr.f32.vlgmr.msra.gmra.mxu0 %v4880_v16  ;;  %8223 = vmatmul.mubr.f32.vlgmr.msra.gmra.mxu1 %v9216_v57  ;;  %v5898_v51 = vand.u32 4294901760, %v9365_v47 }
  0xcb   : > { %8226 = vmatpush3.msra.mxu0 %v9214_v56  ;;  %8232 = vmatprep.subr.mxu1 %v9200_v49  ;;  %v7485_v56 = vld [vmem:[%s9751_s1 + $0xc8] sm:$0xff] }
  0xcc   : > { %8227 = vmatprep.subr.mxu0 %v9221_v58  ;;  %8233 = vmatpush3.msra.mxu1 %v9200_v49  ;;  %v9414_v0 = vand.u32 4294901760, %v7485_v56 }
  0xcd   : > { %8228 = vmatpush3.msra.mxu0 %v9221_v58  ;;  %8234 = vmatprep.subr.mxu1 %v9206_v52 }
  0xce   : > { %8229 = vmatprep.mubr.f32.mxu0 %v9225_v59  ;;  %8235 = vmatpush3.msra.mxu1 %v9206_v52  ;;  %v7484_v59 = vld [vmem:[%s9751_s1 + $0xc0] sm:$0xff]  ;;  %v9428_v9 = vsub.f32 %v7485_v56, %v9414_v0 }
  0xcf   : > { %8236 = vmatprep.mubr.f32.mxu1 %v4868_v63  ;;  %8239 = vmatprep.subr.mxu0 %v9230_v60  ;;  %v5956_v63 = vand.u32 4294901760, %v5955_v54  ;;  %v9419_v3 = vand.u32 4294901760, %v7484_v59 }
  0xd0   : > { %8230 = vmatmul.mubr.f32.vlgmr.msra.gmra.mxu0 %v9235_v61  ;;  %8237 = vmatmul.mubr.f32.vlgmr.msra.gmra.mxu1 %v4878_v1  ;;  %v6334_v61 = vld [vmem:[#allocation2 + $0x25] sm:$0xff]  ;;  %v9444_v15 = vand.u32 4294901760, %v9428_v9 }
  0xd1   : > { %8240 = vmatpush3.msra.mxu0 %v9230_v60  ;;  %8246 = vmatprep.subr.mxu1 %v9200_v49  ;;  %v6342_v5 = vsel %vm147_vm1, %v6334_v61, 0  ;;  %v9431_v10 = vsub.f32 %v7484_v59, %v9419_v3 }
  0xd2   : > { %8241 = vmatprep.subr.mxu0 %v9240_v62  ;;  %8247 = vmatpush3.msra.mxu1 %v9200_v49  ;;  %v9375_v49 = vsub.f32 %v5827_v41, %v9356_v45 }
  0xd3   : > { %8242 = vmatpush3.msra.mxu0 %v9240_v62  ;;  %8248 = vmatprep.subr.mxu1 %v9206_v52 }
  0xd4   : > { %8243 = vmatprep.mubr.f32.mxu0 %v9210_v55  ;;  %8249 = vmatpush3.msra.mxu1 %v9206_v52  ;;  %v5948_v52 = vsub.f32 %v9354_v44, %v9370_v48  ;;  %v5908_v53 = vand.u32 4294901760, %v9375_v49 }
  0xd5   : > { %8250 = vmatprep.mubr.f32.mxu1 %v9210_v55  ;;  %8253 = vmatprep.subr.mxu0 %v9270_v11  ;;  %v5899_v55 = vsub.f32 %v9365_v47, %v5898_v51 }
  0xd6   : > { %8244 = vmatmul.mubr.f32.vlgmr.msra.gmra.mxu0 %v9216_v57  ;;  %8251 = vmatmul.mubr.f32.vlgmr.msra.gmra.mxu1 %v9216_v57  ;;  %v6333_v57 = vld [vmem:[#allocation2 + $0x1d] sm:$0xff]  ;;  %v5949_v58 = vand.u32 4294901760, %v5948_v52  ;;  %v5909_v60 = vsub.f32 %v9375_v49, %v5908_v53 }
  0xd7   : > { %8254 = vmatpush3.msra.mxu0 %v9270_v11  ;;  %8260 = vmatprep.subr.mxu1 %v5434_v32  ;;  %v6339_v1 = vsel %vm147_vm1, %v6333_v57, 0  ;;  %v5900_v2 = vand.u32 4294901760, %v5899_v55 }
  0xd8   : > { %8255 = vmatprep.subr.mxu0 %v9276_v14  ;;  %8261 = vmatpush3.msra.mxu1 %v5434_v32  ;;  %v5910_v6 = vand.u32 4294901760, %v5909_v60  ;;  %v9424_v7 = vand.u32 4294901760, %v6339_v1 }
  0xd9   : > { %8256 = vmatpush3.msra.mxu0 %v9276_v14  ;;  %8262 = vmatprep.subr.mxu1 %v5441_v36 }
  0xda   : > { %8257 = vmatprep.mubr.f32.mxu0 %v5385_v39  ;;  %8263 = vmatpush3.msra.mxu1 %v5441_v36  ;;  %v9439_v13 = vsub.f32 %v6339_v1, %v9424_v7 }
  0xdb   : > { %8264 = vmatprep.mubr.f32.mxu1 %v9280_v17  ;;  %8267 = vmatprep.subr.mxu0 %v9284_v18 }
  0xdc   : > { %8258 = vmatmul.mubr.f32.vlgmr.msra.gmra.mxu0 %v5395_v42  ;;  %8265 = vmatmul.mubr.f32.vlgmr.msra.gmra.mxu1 %v9286_v19  ;;  %v7486_v42 = vld [vmem:[%s9751_s1 + $0xd0] sm:$0xff] }
  0xdd   : > { %8268 = vmatpush3.msra.mxu0 %v9284_v18  ;;  %8274 = vmatprep.subr.mxu1 %v9270_v11 }
  0xde   : > { %8269 = vmatprep.subr.mxu0 %v9291_v20  ;;  %8275 = vmatpush3.msra.mxu1 %v9270_v11 }
  0xdf   : > { %8270 = vmatpush3.msra.mxu0 %v9291_v20  ;;  %8276 = vmatprep.subr.mxu1 %v9276_v14 }
  0xe0   : > { %8271 = vmatprep.mubr.f32.mxu0 %v9295_v22  ;;  %8277 = vmatpush3.msra.mxu1 %v9276_v14 }
  0xe1   : > { %8278 = vmatprep.mubr.f32.mxu1 %v5383_v25  ;;  %8281 = vmatprep.subr.mxu0 %v9300_v23 }
  0xe2   : > { %8272 = vmatmul.mubr.f32.vlgmr.msra.gmra.mxu0 %v9305_v21  ;;  %8279 = vmatmul.mubr.f32.vlgmr.msra.gmra.mxu1 %v5393_v27 }
  0xe3   : > { %8282 = vmatpush3.msra.mxu0 %v9300_v23  ;;  %8288 = vmatprep.subr.mxu1 %v9270_v11  ;;  %v6413_v23 = vand.u32 4294901760, %v9439_v13 }
  0xe4   : > { %8283 = vmatprep.subr.mxu0 %v9310_v24  ;;  %8289 = vmatpush3.msra.mxu1 %v9270_v11  ;;  %v9433_v11 = vand.u32 4294901760, %v6342_v5 }
  0xe5   : > { %8284 = vmatpush3.msra.mxu0 %v9310_v24  ;;  %8290 = vmatprep.subr.mxu1 %v9276_v14  ;;  %v6463_v24 = vsub.f32 %v9428_v9, %v9444_v15  ;;  %v6414_v32 = vsub.f32 %v9439_v13, %v6413_v23 }
  0xe6   : > { %8285 = vmatprep.mubr.f32.mxu0 %v9280_v17  ;;  %8291 = vmatpush3.msra.mxu1 %v9276_v14  ;;  %v7846_v62 = vpop.f32.mrf.mxu1  ;;  %v9452_v18 = vsub.f32 %v6342_v5, %v9433_v11 }
  0xe7   : > { %8292 = vmatprep.mubr.f32.mxu1 %v9280_v17  ;;  %8295 = vmatprep.subr.mxu0 %v9340_v37  ;;  %v9449_v17 = vand.u32 4294901760, %v9431_v10  ;;  %v6464_v36 = vand.u32 4294901760, %v6463_v24 }
  0xe8   : > { %8286 = vmatmul.mubr.f32.vlgmr.msra.gmra.mxu0 %v9286_v19  ;;  %8293 = vmatmul.mubr.f32.vlgmr.msra.gmra.mxu1 %v9286_v19  ;;  %v337_v4 = vpop.f32.mrf.mxu1  ;;  %v6423_v27 = vand.u32 4294901760, %v9452_v18 }
  0xe9   : > { %8296 = vmatpush3.msra.mxu0 %v9340_v37  ;;  %8302 = vmatprep.subr.mxu1 %v5949_v58  ;;  %v6470_v26 = vsub.f32 %v9431_v10, %v9449_v17 }
  0xea   : > { %8297 = vmatprep.subr.mxu0 %v9346_v40  ;;  %8303 = vmatpush3.msra.mxu1 %v5949_v58  ;;  %v7860_v8 = vpop.f32.mrf.mxu1  ;;  %v6424_v41 = vsub.f32 %v9452_v18, %v6423_v27 }
  0xeb   : > { %8298 = vmatpush3.msra.mxu0 %v9346_v40  ;;  %8304 = vmatprep.subr.mxu1 %v5956_v63 }
  0xec   : > { %8299 = vmatprep.mubr.f32.mxu0 %v5900_v2  ;;  %8305 = vmatpush3.msra.mxu1 %v5956_v63  ;;  %v501_v12 = vpop.f32.mrf.mxu1  ;;  %v6425_v56 = vand.u32 4294901760, %v6424_v41 }
  0xed   : > { %8306 = vmatprep.mubr.f32.mxu1 %v9350_v43  ;;  %8309 = vmatprep.subr.mxu0 %v9354_v44 }
  0xee   : > { %8300 = vmatmul.mubr.f32.vlgmr.msra.gmra.mxu0 %v5910_v6  ;;  %8307 = vmatmul.mubr.f32.vlgmr.msra.gmra.mxu1 %v9356_v45  ;;  %v7839_v14 = vpop.f32.mrf.mxu0  ;;  %v7874_v22 = vpop.f32.mrf.mxu1 }
  0xef   : > { %8310 = vmatpush3.msra.mxu0 %v9354_v44  ;;  %8316 = vmatprep.subr.mxu1 %v9340_v37  ;;  %v344_v16 = vadd.f32 %v7846_v62, %v7839_v14  ;;  %v6849_v44 = vld [vmem:[#allocation2 + $0x26] sm:$0xff] }
  0xf0   : > { %8311 = vmatprep.subr.mxu0 %v9361_v46  ;;  %8317 = vmatpush3.msra.mxu1 %v9340_v37  ;;  %v246_v19 = vpop.f32.mrf.mxu0  ;;  %v665_v31 = vpop.f32.mrf.mxu1 }
  0xf1   : > { %8312 = vmatpush3.msra.mxu0 %v9361_v46  ;;  %8318 = vmatprep.subr.mxu1 %v9346_v40  ;;  %v338_v20 = vadd.f32 %v337_v4, %v246_v19 }
  0xf2   : > { %8313 = vmatprep.mubr.f32.mxu0 %v9365_v47  ;;  %8319 = vmatpush3.msra.mxu1 %v9346_v40  ;;  %v7853_v21 = vpop.f32.mrf.mxu0  ;;  %v9492_v47 = vand.u32 4294901760, %v7487_v33 }
  0xf3   : > { %8320 = vmatprep.mubr.f32.mxu1 %v5898_v51  ;;  %8323 = vmatprep.subr.mxu0 %v9370_v48  ;;  %v427_v25 = vadd.f32 %v7853_v21, %v344_v16  ;;  %v6415_v51 = vand.u32 4294901760, %v6414_v32 }
  0xf4   : > { %8314 = vmatmul.mubr.f32.vlgmr.msra.gmra.mxu0 %v9375_v49  ;;  %8321 = vmatmul.mubr.f32.vlgmr.msra.gmra.mxu1 %v5908_v53  ;;  %v419_v28 = vpop.f32.mrf.mxu0  ;;  %v9498_v53 = vand.u32 4294901760, %v7486_v42 }
  0xf5   : > { %8324 = vmatpush3.msra.mxu0 %v9370_v48  ;;  %8330 = vmatprep.subr.mxu1 %v9340_v37  ;;  %v510_v29 = vadd.f32 %v7860_v8, %v427_v25  ;;  %v420_v30 = vadd.f32 %v419_v28, %v338_v20  ;;  %v6854_v48 = vsel %vm147_vm1, %v6848_v34, 0 }
  0xf6   : > { %8325 = vmatprep.subr.mxu0 %v9380_v50  ;;  %8331 = vmatpush3.msra.mxu1 %v9340_v37  ;;  %v7867_v35 = vpop.f32.mrf.mxu0  ;;  %v6471_v37 = vand.u32 4294901760, %v6470_v26  ;;  %v9502_v57 = vand.u32 4294901760, %v6854_v48  ;;  %v9513_v63 = vsub.f32 %v7486_v42, %v9498_v53 }
  0xf7   : > { %8326 = vmatpush3.msra.mxu0 %v9380_v50  ;;  %8332 = vmatprep.subr.mxu1 %v9346_v40  ;;  %v502_v38 = vadd.f32 %v501_v12, %v420_v30  ;;  %v593_v39 = vadd.f32 %v7867_v35, %v510_v29 }
  0xf8   : > { %8327 = vmatprep.mubr.f32.mxu0 %v9350_v43  ;;  %8333 = vmatpush3.msra.mxu1 %v9346_v40  ;;  %v586_v46 = vpop.f32.mrf.mxu0  ;;  %v9517_v2 = vsub.f32 %v6854_v48, %v9502_v57 }
  0xf9   : > { %8334 = vmatprep.mubr.f32.mxu1 %v9350_v43  ;;  %8337 = vmatprep.subr.mxu0 %v9414_v0  ;;  %v672_v40 = vadd.f32 %v7874_v22, %v593_v39  ;;  %v587_v49 = vadd.f32 %v586_v46, %v502_v38  ;;  %v7888_v50 = vpop.f32.mrf.mxu1  ;;  %v6857_v43 = vsel %vm147_vm1, %v6849_v44, 0 }
  0xfa   : > { %8328 = vmatmul.mubr.f32.vlgmr.msra.gmra.mxu0 %v9356_v45  ;;  %8335 = vmatmul.mubr.f32.vlgmr.msra.gmra.mxu1 %v9356_v45  ;;  %v7881_v52 = vpop.f32.mrf.mxu0  ;;  %v9506_v45 = vsub.f32 %v7487_v33, %v9492_v47  ;;  %v9508_v62 = vand.u32 4294901760, %v6857_v43  ;;  %v6928_v22 = vand.u32 4294901760, %v9517_v2 }
  0xfb   : > { %8338 = vmatpush3.msra.mxu0 %v9414_v0  ;;  %8344 = vmatprep.subr.mxu1 %v6464_v36  ;;  %v666_v54 = vadd.f32 %v665_v31, %v587_v49  ;;  %v765_v55 = vadd.f32 %v7881_v52, %v672_v40  ;;  %v845_v59 = vpop.f32.mrf.mxu1 }
  0xfc   : > { %8339 = vmatprep.subr.mxu0 %v9419_v3  ;;  %8345 = vmatpush3.msra.mxu1 %v6464_v36  ;;  %v754_v58 = vpop.f32.mrf.mxu0  ;;  %v9522_v6 = vand.u32 4294901760, %v9506_v45  ;;  %v9527_v12 = vsub.f32 %v6857_v43, %v9508_v62 }
  0xfd   : > { %8340 = vmatpush3.msra.mxu0 %v9419_v3  ;;  %8346 = vmatprep.subr.mxu1 %v6471_v37  ;;  %v852_v60 = vadd.f32 %v7888_v50, %v765_v55  ;;  %v755_v61 = vadd.f32 %v754_v58, %v666_v54 }
  0xfe   : > { %8341 = vmatprep.mubr.f32.mxu0 %v6415_v51  ;;  %8347 = vmatpush3.msra.mxu1 %v6471_v37  ;;  %v6938_v24 = vand.u32 4294901760, %v9527_v12 }
  0xff   : > { %8348 = vmatprep.mubr.f32.mxu1 %v9424_v7  ;;  %8351 = vmatprep.subr.mxu0 %v9428_v9  ;;  %v846_v1 = vadd.f32 %v845_v59, %v755_v61 }
 0x100   : > { %8342 = vmatmul.mubr.f32.vlgmr.msra.gmra.mxu0 %v6425_v56  ;;  %8349 = vmatmul.mubr.f32.vlgmr.msra.gmra.mxu1 %v9433_v11  ;;  %v7895_v4 = vpop.f32.mrf.mxu0  ;;  %v7902_v5 = vpop.f32.mrf.mxu1 }
 0x101   : > { %8352 = vmatpush3.msra.mxu0 %v9428_v9  ;;  %8358 = vmatprep.subr.mxu1 %v9414_v0  ;;  %v935_v8 = vadd.f32 %v7895_v4, %v852_v60  ;;  %v9532_v9 = vand.u32 4294901760, %v9513_v63 }
 0x102   : > { %8353 = vmatprep.subr.mxu0 %v9431_v10  ;;  %8359 = vmatpush3.msra.mxu1 %v9414_v0  ;;  %v927_v14 = vpop.f32.mrf.mxu0  ;;  %v1009_v16 = vpop.f32.mrf.mxu1 }
 0x103   : > { %8354 = vmatpush3.msra.mxu0 %v9431_v10  ;;  %8360 = vmatprep.subr.mxu1 %v9419_v3  ;;  %v1018_v19 = vadd.f32 %v7902_v5, %v935_v8  ;;  %v928_v20 = vadd.f32 %v927_v14, %v846_v1  ;;  %v6978_v10 = vsub.f32 %v9506_v45, %v9522_v6 }
 0x104   : > { %8355 = vmatprep.mubr.f32.mxu0 %v9439_v13  ;;  %8361 = vmatpush3.msra.mxu1 %v9419_v3  ;;  %v6985_v13 = vsub.f32 %v9513_v63, %v9532_v9 }
 0x105   : > { %8362 = vmatprep.mubr.f32.mxu1 %v6413_v23  ;;  %8365 = vmatprep.subr.mxu0 %v9444_v15  ;;  %v1010_v21 = vadd.f32 %v1009_v16, %v928_v20 }
 0x106   : > { %8356 = vmatmul.mubr.f32.vlgmr.msra.gmra.mxu0 %v9452_v18  ;;  %8363 = vmatmul.mubr.f32.vlgmr.msra.gmra.mxu1 %v6423_v27  ;;  %v7909_v25 = vpop.f32.mrf.mxu0  ;;  %v7916_v26 = vpop.f32.mrf.mxu1  ;;  %v6929_v18 = vsub.f32 %v9517_v2, %v6928_v22  ;;  %v6986_v31 = vand.u32 4294901760, %v6985_v13 }
 0x107   : > { %8366 = vmatpush3.msra.mxu0 %v9444_v15  ;;  %8372 = vmatprep.subr.mxu1 %v9414_v0  ;;  %v1101_v23 = vadd.f32 %v7909_v25, %v1018_v19  ;;  %v6979_v15 = vand.u32 4294901760, %v6978_v10 }
 0x108   : > { %8367 = vmatprep.subr.mxu0 %v9449_v17  ;;  %8373 = vmatpush3.msra.mxu1 %v9414_v0  ;;  %v1094_v27 = vpop.f32.mrf.mxu0  ;;  %v1173_v28 = vpop.f32.mrf.mxu1  ;;  %v6939_v0 = vsub.f32 %v9527_v12, %v6938_v24  ;;  %v6930_v32 = vand.u32 4294901760, %v6929_v18 }
 0x109   : > { %8368 = vmatpush3.msra.mxu0 %v9449_v17  ;;  %8374 = vmatprep.subr.mxu1 %v9419_v3  ;;  %v9557_v29 = vadd.f32 %v7916_v26, %v1101_v23  ;;  %v1095_v30 = vadd.f32 %v1094_v27, %v1010_v21 }
 0x10a   : > { %8369 = vmatprep.mubr.f32.mxu0 %v9424_v7  ;;  %8375 = vmatpush3.msra.mxu1 %v9419_v3 }
 0x10b   : > { %8376 = vmatprep.mubr.f32.mxu1 %v9424_v7  ;;  %8379 = vmatprep.subr.mxu0 %v9492_v47  ;;  %v9566_v17 = vadd.f32 %v1173_v28, %v1095_v30  ;;  %v6940_v7 = vand.u32 4294901760, %v6939_v0 }
 0x10c   : > { %8370 = vmatmul.mubr.f32.vlgmr.msra.gmra.mxu0 %v9433_v11  ;;  %8377 = vmatmul.mubr.f32.vlgmr.msra.gmra.mxu1 %v9433_v11  ;;  %v7923_v33 = vpop.f32.mrf.mxu0  ;;  %v7930_v34 = vpop.f32.mrf.mxu1 }
 0x10d   : > { %8380 = vmatpush3.msra.mxu0 %v9492_v47  ;;  %8386 = vmatprep.subr.mxu1 %v6979_v15  ;;  %v1365_v3 = vadd.f32 %v7930_v34, %v7923_v33 }
 0x10e   : > { %8381 = vmatprep.subr.mxu0 %v9498_v53  ;;  %8387 = vmatpush3.msra.mxu1 %v6979_v15  ;;  %v1267_v35 = vpop.f32.mrf.mxu0  ;;  %v1358_v36 = vpop.f32.mrf.mxu1 }
 0x10f   : > { %8382 = vmatpush3.msra.mxu0 %v9498_v53  ;;  %8388 = vmatprep.subr.mxu1 %v6986_v31  ;;  %v1359_v38 = vadd.f32 %v1358_v36, %v1267_v35 }
 0x110   : > { %8383 = vmatprep.mubr.f32.mxu0 %v6930_v32  ;;  %8389 = vmatpush3.msra.mxu1 %v6986_v31 }
 0x111   : > { %8390 = vmatprep.mubr.f32.mxu1 %v9502_v57  ;;  %8393 = vmatprep.subr.mxu0 %v9506_v45 }
 0x112   : > { %8384 = vmatmul.mubr.f32.vlgmr.msra.gmra.mxu0 %v6940_v7  ;;  %8391 = vmatmul.mubr.f32.vlgmr.msra.gmra.mxu1 %v9508_v62  ;;  %v7937_v11 = vpop.f32.mrf.mxu0  ;;  %v7944_v39 = vpop.f32.mrf.mxu1 }
 0x113   : > { %8394 = vmatpush3.msra.mxu0 %v9506_v45  ;;  %8400 = vmatprep.subr.mxu1 %v9492_v47  ;;  %v1448_v37 = vadd.f32 %v7937_v11, %v1365_v3 }
 0x114   : > { %8395 = vmatprep.subr.mxu0 %v9513_v63  ;;  %8401 = vmatpush3.msra.mxu1 %v9492_v47  ;;  %v1440_v41 = vpop.f32.mrf.mxu0  ;;  %v1522_v42 = vpop.f32.mrf.mxu1 }
 0x115   : > { %8396 = vmatpush3.msra.mxu0 %v9513_v63  ;;  %8402 = vmatprep.subr.mxu1 %v9498_v53  ;;  %v1531_v44 = vadd.f32 %v7944_v39, %v1448_v37  ;;  %v1441_v46 = vadd.f32 %v1440_v41, %v1359_v38 }
 0x116   : > { %8397 = vmatprep.mubr.f32.mxu0 %v9517_v2  ;;  %8403 = vmatpush3.msra.mxu1 %v9498_v53 }
 0x117   : > { %8404 = vmatprep.mubr.f32.mxu1 %v6928_v22  ;;  %8407 = vmatprep.subr.mxu0 %v9522_v6  ;;  %v1523_v48 = vadd.f32 %v1522_v42, %v1441_v46 }
 0x118   : > { %8398 = vmatmul.mubr.f32.vlgmr.msra.gmra.mxu0 %v9527_v12  ;;  %8405 = vmatmul.mubr.f32.vlgmr.msra.gmra.mxu1 %v6938_v24  ;;  %v7951_v40 = vpop.f32.mrf.mxu0  ;;  %v7958_v49 = vpop.f32.mrf.mxu1 }
 0x119   : > { %8408 = vmatpush3.msra.mxu0 %v9522_v6  ;;  %8414 = vmatprep.subr.mxu1 %v9492_v47  ;;  %v1614_v50 = vadd.f32 %v7951_v40, %v1531_v44 }
 0x11a   : > { %8409 = vmatprep.subr.mxu0 %v9532_v9  ;;  %8415 = vmatpush3.msra.mxu1 %v9492_v47  ;;  %v1607_v51 = vpop.f32.mrf.mxu0  ;;  %v1686_v52 = vpop.f32.mrf.mxu1 }
 0x11b   : > { %8410 = vmatpush3.msra.mxu0 %v9532_v9  ;;  %8416 = vmatprep.subr.mxu1 %v9498_v53  ;;  %v1693_v43 = vadd.f32 %v7958_v49, %v1614_v50  ;;  %v1608_v54 = vadd.f32 %v1607_v51, %v1523_v48 }
 0x11c   : > { %8411 = vmatprep.mubr.f32.mxu0 %v9502_v57  ;;  %8417 = vmatpush3.msra.mxu1 %v9498_v53 }
 0x11d   : > { %8418 = vmatprep.mubr.f32.mxu1 %v9502_v57  ;;  %8412 = vmatmul.mubr.f32.vlgmr.msra.gmra.mxu0 %v9508_v62  ;;  %v1697_v55 = vadd.f32 %v1693_v43, %v9557_v29  ;;  %v1687_v56 = vadd.f32 %v1686_v52, %v1608_v54 }
 0x11e   : > { %8419 = vmatmul.mubr.f32.vlgmr.msra.gmra.mxu1 %v9508_v62  ;;  %v7965_v47 = vpop.f32.mrf.mxu0  ;;  %v7972_v58 = vpop.f32.mrf.mxu1 }
 0x11f   : > { %v1696_v59 = vadd.f32 %v1687_v56, %v9566_v17  ;;  %v1880_v45 = vadd.f32 %v7972_v58, %v7965_v47 }
 0x120   : > { %v1782_v60 = vpop.f32.mrf.mxu0  ;;  %v1873_v61 = vpop.f32.mrf.mxu1 }
 0x121   : > { %v1874_v63 = vadd.f32 %v1873_v61, %v1782_v60 }
 0x124   : > { %v7979_v1 = vpop.f32.mrf.mxu0  ;;  %v7986_v2 = vpop.f32.mrf.mxu1 }
 0x125   : > { %v1963_v53 = vadd.f32 %v7979_v1, %v1880_v45 }
 0x126   : > { %v1955_v4 = vpop.f32.mrf.mxu0  ;;  %v2037_v57 = vpop.f32.mrf.mxu1 }
 0x127   : > { %v2046_v5 = vadd.f32 %v7986_v2, %v1963_v53  ;;  %v1956_v6 = vadd.f32 %v1955_v4, %v1874_v63 }
 0x129   : > { %v2038_v8 = vadd.f32 %v2037_v57, %v1956_v6 }
 0x12a   : > { %v7993_v12 = vpop.f32.mrf.mxu0  ;;  %v8000_v14 = vpop.f32.mrf.mxu1 }
 0x12b   : > { %v2129_v16 = vadd.f32 %v7993_v12, %v2046_v5 }
 0x12c   : > { %v2122_v62 = vpop.f32.mrf.mxu0  ;;  %v2201_v9 = vpop.f32.mrf.mxu1 }
 0x12d   : > { %v2208_v19 = vadd.f32 %v8000_v14, %v2129_v16  ;;  %v2123_v20 = vadd.f32 %v2122_v62, %v2038_v8 }
 0x12f   : > { %v2212_v22 = vadd.f32 %v2208_v19, %v1697_v55  ;;  %v2202_v10 = vadd.f32 %v2201_v9, %v2123_v20 }
 0x130   : > { %v8007_v21 = vpop.f32.mrf.mxu0  ;;  %v8014_v24 = vpop.f32.mrf.mxu1 }
 0x131   : > { %v2211_v25 = vadd.f32 %v2202_v10, %v1696_v59  ;;  %v2395_v26 = vadd.f32 %v8014_v24, %v8007_v21 }
 0x132   : > { %v2297_v13 = vpop.f32.mrf.mxu0  ;;  %v2388_v23 = vpop.f32.mrf.mxu1 }
 0x133   : > { %v2389_v18 = vadd.f32 %v2388_v23, %v2297_v13 }
 0x136   : > { %v8021_v27 = vpop.f32.mrf.mxu0  ;;  %v8028_v28 = vpop.f32.mrf.mxu1 }
 0x137   : > { %v2478_v15 = vadd.f32 %v8021_v27, %v2395_v26 }
 0x138   : > { %v2470_v29 = vpop.f32.mrf.mxu0  ;;  %v2552_v30 = vpop.f32.mrf.mxu1 }
 0x139   : > { %v2561_v0 = vadd.f32 %v8028_v28, %v2478_v15  ;;  %v2471_v31 = vadd.f32 %v2470_v29, %v2389_v18 }
 0x13b   : > { %v2553_v17 = vadd.f32 %v2552_v30, %v2471_v31 }
 0x13c   : > { %v8035_v32 = vpop.f32.mrf.mxu0  ;;  %v8042_v33 = vpop.f32.mrf.mxu1 }
 0x13d   : > { %v2644_v34 = vadd.f32 %v8035_v32, %v2561_v0 }
 0x13e   : > { %v2637_v3 = vpop.f32.mrf.mxu0  ;;  %v2716_v7 = vpop.f32.mrf.mxu1 }
 0x13f   : > { %v2723_v35 = vadd.f32 %v8042_v33, %v2644_v34  ;;  %v2638_v36 = vadd.f32 %v2637_v3, %v2553_v17 }
 0x141   : > { %v2727_v38 = vadd.f32 %v2723_v35, %v2212_v22  ;;  %v2717_v11 = vadd.f32 %v2716_v7, %v2638_v36 }
 0x142   : > { %v8049_v39 = vpop.f32.mrf.mxu0  ;;  %v8056_v37 = vpop.f32.mrf.mxu1 }
 0x143   : > { %v2726_v41 = vadd.f32 %v2717_v11, %v2211_v25  ;;  %v2910_v42 = vadd.f32 %v8056_v37, %v8049_v39 }
 0x144   : > { %v2812_v44 = vpop.f32.mrf.mxu0  ;;  %v2903_v46 = vpop.f32.mrf.mxu1 }
 0x145   : > { %v2904_v48 = vadd.f32 %v2903_v46, %v2812_v44 }
 0x148   : > { %v8063_v40 = vpop.f32.mrf.mxu0  ;;  %v8070_v49 = vpop.f32.mrf.mxu1 }
 0x149   : > { %v2993_v50 = vadd.f32 %v8063_v40, %v2910_v42 }
 0x14a   : > { %v2985_v51 = vpop.f32.mrf.mxu0  ;;  %v3067_v52 = vpop.f32.mrf.mxu1 }
 0x14b   : > { %v3076_v43 = vadd.f32 %v8070_v49, %v2993_v50  ;;  %v2986_v54 = vadd.f32 %v2985_v51, %v2904_v48 }
 0x14d   : > { %v3068_v55 = vadd.f32 %v3067_v52, %v2986_v54 }
 0x14e   : > { %v8077_v56 = vpop.f32.mrf.mxu0  ;;  %v8084_v47 = vpop.f32.mrf.mxu1 }
 0x14f   : > { %v3159_v58 = vadd.f32 %v8077_v56, %v3076_v43 }
 0x150   : > { %v3152_v59 = vpop.f32.mrf.mxu0  ;;  %v3231_v45 = vpop.f32.mrf.mxu1 }
 0x151   : > { %v3238_v60 = vadd.f32 %v8084_v47, %v3159_v58  ;;  %v3153_v61 = vadd.f32 %v3152_v59, %v3068_v55 }
 0x153   : > { %v3242_v63 = vadd.f32 %v3238_v60, %v2727_v38  ;;  %v3232_v1 = vadd.f32 %v3231_v45, %v3153_v61 }
 0x154   : > { %v8091_v2 = vpop.f32.mrf.mxu0  ;;  %v8098_v53 = vpop.f32.mrf.mxu1 }
 0x155   : > { %v3241_v4 = vadd.f32 %v3232_v1, %v2726_v41  ;;  %v3425_v57 = vadd.f32 %v8098_v53, %v8091_v2 }
 0x156   : > { %v3327_v5 = vpop.f32.mrf.mxu0  ;;  %v3418_v6 = vpop.f32.mrf.mxu1 }
 0x157   : > { %v3419_v8 = vadd.f32 %v3418_v6, %v3327_v5 }
 0x15a   : > { %v8105_v12 = vpop.f32.mrf.mxu0  ;;  %v8112_v14 = vpop.f32.mrf.mxu1 }
 0x15b   : > { %v3508_v16 = vadd.f32 %v8105_v12, %v3425_v57 }
 0x15c   : > { %v3500_v62 = vpop.f32.mrf.mxu0  ;;  %v3582_v9 = vpop.f32.mrf.mxu1 }
 0x15d   : > { %v3591_v19 = vadd.f32 %v8112_v14, %v3508_v16  ;;  %v3501_v20 = vadd.f32 %v3500_v62, %v3419_v8 }
 0x15f   : > { %v3583_v22 = vadd.f32 %v3582_v9, %v3501_v20 }
 0x160   : > { %v8119_v10 = vpop.f32.mrf.mxu0  ;;  %v8126_v21 = vpop.f32.mrf.mxu1 }
 0x161   : > { %v3674_v24 = vadd.f32 %v8119_v10, %v3591_v19 }
 0x162   : > { %v3667_v25 = vpop.f32.mrf.mxu0  ;;  %v3746_v26 = vpop.f32.mrf.mxu1 }
 0x163   : > { %v3753_v13 = vadd.f32 %v8126_v21, %v3674_v24  ;;  %v3668_v23 = vadd.f32 %v3667_v25, %v3583_v22 }
 0x165   : > { %v9603_v18 = vadd.f32 %v3753_v13, %v3242_v63  ;;  %v3747_v27 = vadd.f32 %v3746_v26, %v3668_v23 }
 0x166   : > { %v9605_v28 = vpop.f32.mrf.mxu0  ;;  %v9607_v15 = vpop.f32.mrf.mxu1 }
 0x167   : > { %9755 = vst [vmem:[#allocation6_spill] sm:$0xff] %v9603_v18  ;;  %v9609_v29 = vadd.f32 %v3747_v27, %v3241_v4 }
 0x168   : > { %v9611_v30 = vpop.f32.mrf.mxu0  ;;  %v3933_v0 = vpop.f32.mrf.mxu1 }
 0x169   : > { %9756 = vst [vmem:[#allocation7_spill] sm:$0xff] %v9609_v29  ;;  %v3934_v29 = vadd.f32 %v3933_v0, %v9611_v30 }
 0x16c   : > { %v8147_v31 = vpop.f32.mrf.mxu0  ;;  %v9613_v17 = vpop.f32.mrf.mxu1 }
 0x16e   : > { %v9615_v32 = vpop.f32.mrf.mxu0  ;;  %v9617_v33 = vpop.f32.mrf.mxu1 }
 0x172   : > { %v9619_v34 = vpop.f32.mrf.mxu0  ;;  %v9621_v3 = vpop.f32.mrf.mxu1 }
 0x174   : > { %v9623_v7 = vpop.f32.mrf.mxu0  ;;  %v9625_v35 = vpop.f32.mrf.mxu1 }
 0x175   : > { %9757 = vst [vmem:[#allocation8_spill] sm:$0xff] %v9625_v35 }
 0x178   : > { %v8175_v36 = vpop.f32.mrf.mxu0  ;;  %v8182_v38 = vpop.f32.mrf.mxu1 }
 0x17a   : > { %v4357_v11 = vpop.f32.mrf.mxu0  ;;  %v4448_v39 = vpop.f32.mrf.mxu1 }
 0x17e   : > { %v8189_v37 = vpop.f32.mrf.mxu0  ;;  %v9627_v41 = vpop.f32.mrf.mxu1 }
 0x180   : > { %v4530_v42 = vpop.f32.mrf.mxu0  ;;  %v9629_v44 = vpop.f32.mrf.mxu1 }
 0x184   : > { %v9631_v46 = vpop.f32.mrf.mxu0  ;;  %v9633_v48 = vpop.f32.mrf.mxu1 }
 0x185   : > { %9758 = vst [vmem:[#allocation9_spill] sm:$0xff] %v9633_v48 }
 0x186   : > { %v9635_v40 = vpop.f32.mrf.mxu0  ;;  %v9637_v49 = vpop.f32.mrf.mxu1 }
 0x187   : > { %9759 = vst [vmem:[#allocation10_spill] sm:$0xff] %v9635_v40  ;;  %9760 = vst [vmem:[#allocation11_spill] sm:$0xff] %v9637_v49 }
 0x18a   : > { %v8217_v50 = vpop.f32.mrf.mxu0  ;;  %v8224_v51 = vpop.f32.mrf.mxu1 }
 0x18c   : > { %v4872_v52 = vpop.f32.mrf.mxu0  ;;  %v4963_v43 = vpop.f32.mrf.mxu1 }
 0x190   : > { %v8231_v54 = vpop.f32.mrf.mxu0  ;;  %v8238_v55 = vpop.f32.mrf.mxu1 }
 0x192   : > { %v5045_v56 = vpop.f32.mrf.mxu0  ;;  %v9639_v47 = vpop.f32.mrf.mxu1 }
 0x196   : > { %v9641_v58 = vpop.f32.mrf.mxu0  ;;  %v9643_v59 = vpop.f32.mrf.mxu1 }
 0x197   : > { %9761 = vst [vmem:[#allocation12_spill] sm:$0xff] %v9641_v58  ;;  %9762 = vst [vmem:[#allocation13_spill] sm:$0xff] %v9643_v59  ;;  %v4455_v59 = vadd.f32 %v8182_v38, %v8175_v36 }
 0x198   : > { %v9645_v45 = vpop.f32.mrf.mxu0  ;;  %v9647_v60 = vpop.f32.mrf.mxu1 }
 0x199   : > { %9763 = vst [vmem:[#allocation14_spill] sm:$0xff] %v9645_v45  ;;  %9764 = vst [vmem:[#allocation15_spill] sm:$0xff] %v9647_v60  ;;  %v3940_v60 = vadd.f32 %v9607_v15, %v9605_v28 }
 0x19c   : > { %v8259_v61 = vpop.f32.mrf.mxu0  ;;  %v8266_v63 = vpop.f32.mrf.mxu1 }
 0x19d   : > { %v5485_v40 = vadd.f32 %v8266_v63, %v8259_v61 }
 0x19e   : > { %v5387_v1 = vpop.f32.mrf.mxu0  ;;  %v5478_v2 = vpop.f32.mrf.mxu1 }
 0x19f   : > { %v5479_v0 = vadd.f32 %v5478_v2, %v5387_v1  ;;  %v9777_v2 = vld [vmem:[#allocation8_spill] sm:$0xff] }
 0x1a2   : > { %v8273_v53 = vpop.f32.mrf.mxu0  ;;  %v8280_v4 = vpop.f32.mrf.mxu1 }
 0x1a4   : > { %v5560_v57 = vpop.f32.mrf.mxu0  ;;  %v9649_v5 = vpop.f32.mrf.mxu1 }
 0x1a5   : > { %9765 = vst [vmem:[#allocation16_spill] sm:$0xff] %v9649_v5  ;;  %v4964_v5 = vadd.f32 %v4963_v43, %v4872_v52 }
 0x1a7   : > { %v5046_v30 = vadd.f32 %v5045_v56, %v4964_v5 }
 0x1a8   : > { %v9651_v6 = vpop.f32.mrf.mxu0  ;;  %v9653_v8 = vpop.f32.mrf.mxu1 }
 0x1a9   : > { %9766 = vst [vmem:[#allocation17_spill] sm:$0xff] %v9651_v6  ;;  %9767 = vst [vmem:[#allocation18_spill] sm:$0xff] %v9653_v8  ;;  %v4538_v6 = vadd.f32 %v8189_v37, %v4455_v59 }
 0x1aa   : > { %v9655_v12 = vpop.f32.mrf.mxu0  ;;  %v9657_v14 = vpop.f32.mrf.mxu1 }
 0x1ab   : > { %9768 = vst [vmem:[#allocation19_spill] sm:$0xff] %v9655_v12  ;;  %9769 = vst [vmem:[#allocation20_spill] sm:$0xff] %v9657_v14  ;;  %v4023_v12 = vadd.f32 %v8147_v31, %v3940_v60  ;;  %v4621_v15 = vadd.f32 %v9627_v41, %v4538_v6  ;;  %v5568_v31 = vadd.f32 %v8273_v53, %v5485_v40  ;;  %v9778_v53 = vld [vmem:[#allocation9_spill] sm:$0xff] }
 0x1ac   : > { %v5128_v40 = vadd.f32 %v9639_v47, %v5046_v30 }
 0x1ad   : > { %v4106_v48 = vadd.f32 %v9613_v17, %v4023_v12  ;;  %v5561_v17 = vadd.f32 %v5560_v57, %v5479_v0  ;;  %v4704_v41 = vadd.f32 %v9631_v46, %v4621_v15  ;;  %v5651_v43 = vadd.f32 %v8280_v4, %v5568_v31  ;;  %v9779_v4 = vld [vmem:[#allocation14_spill] sm:$0xff]  ;;  %v9787_v15 = vld [vmem:[#allocation15_spill] sm:$0xff] }
 0x1ae   : > { %v8301_v16 = vpop.f32.mrf.mxu0  ;;  %v8308_v62 = vpop.f32.mrf.mxu1  ;;  %v5213_v57 = vadd.f32 %v9779_v4, %v5128_v40 }
 0x1af   : > { %v6000_v36 = vadd.f32 %v8308_v62, %v8301_v16  ;;  %v4189_v38 = vadd.f32 %v9619_v34, %v4106_v48  ;;  %v9775_v48 = vld [vmem:[#allocation12_spill] sm:$0xff]  ;;  %v4783_v47 = vadd.f32 %v9778_v53, %v4704_v41  ;;  %v9782_v62 = vld [vmem:[#allocation11_spill] sm:$0xff] }
 0x1b0   : > { %v5902_v9 = vpop.f32.mrf.mxu0  ;;  %v5993_v19 = vpop.f32.mrf.mxu1  ;;  %v9780_v5 = vld [vmem:[#allocation17_spill] sm:$0xff] }
 0x1b1   : > { %v5994_v37 = vadd.f32 %v5993_v19, %v5902_v9  ;;  %v4268_v34 = vadd.f32 %v9621_v3, %v4189_v38  ;;  %v9783_v19 = vld [vmem:[#allocation13_spill] sm:$0xff] }
 0x1b4   : > { %v8315_v20 = vpop.f32.mrf.mxu0  ;;  %v8322_v22 = vpop.f32.mrf.mxu1 }
 0x1b6   : > { %v6075_v10 = vpop.f32.mrf.mxu0  ;;  %v6157_v21 = vpop.f32.mrf.mxu1 }
 0x1ba   : > { %v9659_v24 = vpop.f32.mrf.mxu0  ;;  %v9661_v25 = vpop.f32.mrf.mxu1 }
 0x1bb   : > { %9770 = vst [vmem:[#allocation21_spill] sm:$0xff] %v9659_v24  ;;  %9771 = vst [vmem:[#allocation22_spill] sm:$0xff] %v9661_v25  ;;  %v4016_v24 = vadd.f32 %v9615_v32, %v3934_v29  ;;  %v4449_v25 = vadd.f32 %v4448_v39, %v4357_v11 }
 0x1bc   : > { %v9663_v26 = vpop.f32.mrf.mxu0  ;;  %v9665_v13 = vpop.f32.mrf.mxu1 }
 0x1bd   : > { %9772 = vst [vmem:[#allocation23_spill] sm:$0xff] %v9663_v26  ;;  %9773 = vst [vmem:[#allocation24_spill] sm:$0xff] %v9665_v13  ;;  %v4970_v26 = vadd.f32 %v8224_v51, %v8217_v50  ;;  %v4531_v35 = vadd.f32 %v4530_v42, %v4449_v25  ;;  %v4098_v28 = vadd.f32 %v9617_v33, %v4016_v24 }
 0x1be   : > { %v6083_v42 = vadd.f32 %v8315_v20, %v6000_v36  ;;  %v9784_v20 = vld [vmem:[#allocation19_spill] sm:$0xff] }
 0x1bf   : > { %v5053_v58 = vadd.f32 %v8231_v54, %v4970_v26  ;;  %v4613_v11 = vadd.f32 %v9629_v44, %v4531_v35  ;;  %v4183_v33 = vadd.f32 %v9623_v7, %v4098_v28  ;;  %v6076_v54 = vadd.f32 %v6075_v10, %v5994_v37  ;;  %v9774_v35 = vld [vmem:[#allocation10_spill] sm:$0xff]  ;;  %v9786_v26 = vld [vmem:[#allocation7_spill] sm:$0xff] }
 0x1c0   : > { %v8343_v23 = vpop.f32.mrf.mxu0  ;;  %v8350_v27 = vpop.f32.mrf.mxu1  ;;  %v6166_v61 = vadd.f32 %v8322_v22, %v6083_v42 }
 0x1c1   : > { %v5136_v39 = vadd.f32 %v8238_v55, %v5053_v58  ;;  %v6515_v50 = vadd.f32 %v8350_v27, %v8343_v23  ;;  %v4698_v44 = vadd.f32 %v9774_v35, %v4613_v11  ;;  %v9776_v58 = vld [vmem:[#allocation16_spill] sm:$0xff]  ;;  %v4262_v46 = vadd.f32 %v9777_v2, %v4183_v33 }
 0x1c2   : > { %v6417_v8 = vpop.f32.mrf.mxu0  ;;  %v6508_v14 = vpop.f32.mrf.mxu1  ;;  %v5643_v60 = vadd.f32 %v9776_v58, %v5561_v17  ;;  %v6158_v6 = vadd.f32 %v6157_v21, %v6076_v54  ;;  %v9785_v10 = vld [vmem:[#allocation21_spill] sm:$0xff]  ;;  %v5292_v21 = vadd.f32 %v9787_v15, %v5213_v57 }
 0x1c3   : > { %v6509_v56 = vadd.f32 %v6508_v14, %v6417_v8  ;;  %v5219_v55 = vadd.f32 %v9775_v48, %v5136_v39  ;;  %v9781_v14 = vld [vmem:[#allocation6_spill] sm:$0xff]  ;;  %v4777_v9 = vadd.f32 %v9782_v62, %v4698_v44  ;;  %v6249_v24 = vadd.f32 %v9785_v10, %v6166_v61 }
 0x1c4   : > { %v4272_v16 = vadd.f32 %v4268_v34, %v9781_v14  ;;  %v5728_v22 = vadd.f32 %v9784_v20, %v5643_v60  ;;  %v4271_v23 = vadd.f32 %v4262_v46, %v9786_v26  ;;  %v9789_v0 = vld [vmem:[#allocation23_spill] sm:$0xff]  ;;  %v9792_v44 = vld [vmem:[#allocation24_spill] sm:$0xff] }
 0x1c5   : > { %v6243_v31 = vadd.f32 %v9789_v0, %v6158_v6 }
 0x1c6   : > { %v8357_v49 = vpop.f32.mrf.mxu0  ;;  %v8364_v18 = vpop.f32.mrf.mxu1  ;;  %v4787_v27 = vadd.f32 %v4783_v47, %v4272_v16  ;;  %v4786_v39 = vadd.f32 %v4777_v9, %v4271_v23 }
 0x1c7   : > { %v6598_v59 = vadd.f32 %v8357_v49, %v6515_v50  ;;  %v5734_v49 = vadd.f32 %v9780_v5, %v5651_v43  ;;  %v9790_v50 = vld [vmem:[#allocation20_spill] sm:$0xff]  ;;  %v6322_v48 = vadd.f32 %v9792_v44, %v6243_v31 }
 0x1c8   : > { %v6590_v45 = vpop.f32.mrf.mxu0  ;;  %v6672_v13 = vpop.f32.mrf.mxu1  ;;  %v5807_v33 = vadd.f32 %v9790_v50, %v5728_v22  ;;  %v5301_v34 = vadd.f32 %v5292_v21, %v4786_v39 }
 0x1c9   : > { %v6591_v63 = vadd.f32 %v6590_v45, %v6509_v56  ;;  %v6681_v3 = vadd.f32 %v8364_v18, %v6598_v59  ;;  %v5298_v45 = vadd.f32 %v9783_v19, %v5219_v55  ;;  %v9788_v18 = vld [vmem:[#allocation18_spill] sm:$0xff] }
 0x1ca   : > { %v5813_v30 = vadd.f32 %v9788_v18, %v5734_v49  ;;  %v5816_v60 = vadd.f32 %v5807_v33, %v5301_v34 }
 0x1cb   : > { %v6673_v25 = vadd.f32 %v6672_v13, %v6591_v63  ;;  %v5302_v42 = vadd.f32 %v5298_v45, %v4787_v27  ;;  %v9791_v13 = vld [vmem:[#allocation22_spill] sm:$0xff] }
 0x1cc   : > { %v8371_v29 = vpop.f32.mrf.mxu0  ;;  %v8378_v32 = vpop.f32.mrf.mxu1  ;;  %v6328_v41 = vadd.f32 %v9791_v13, %v6249_v24  ;;  %v6331_v46 = vadd.f32 %v6322_v48, %v5816_v60 }
 0x1cd   : > { %v6764_v36 = vadd.f32 %v8371_v29, %v6681_v3  ;;  %v5817_v35 = vadd.f32 %v5813_v30, %v5302_v42 }
 0x1ce   : > { %v6757_v51 = vpop.f32.mrf.mxu0  ;;  %v6836_v52 = vpop.f32.mrf.mxu1 }
 0x1cf   : > { %v6758_v40 = vadd.f32 %v6757_v51, %v6673_v25  ;;  %v6843_v29 = vadd.f32 %v8378_v32, %v6764_v36  ;;  %v6332_v61 = vadd.f32 %v6328_v41, %v5817_v35 }
 0x1d1   : > { %v6837_v63 = vadd.f32 %v6836_v52, %v6758_v40  ;;  %v6847_v53 = vadd.f32 %v6843_v29, %v6332_v61 }
 0x1d2   : > { %v8385_v1 = vpop.f32.mrf.mxu0  ;;  %v8392_v7 = vpop.f32.mrf.mxu1 }
 0x1d3   : > { %v7030_v28 = vadd.f32 %v8392_v7, %v8385_v1  ;;  %v6846_v57 = vadd.f32 %v6837_v63, %v6331_v46 }
 0x1d4   : > { %v6932_v8 = vpop.f32.mrf.mxu0  ;;  %v7023_v12 = vpop.f32.mrf.mxu1 }
 0x1d5   : > { %v7024_v17 = vadd.f32 %v7023_v12, %v6932_v8 }
 0x1d8   : > { %v8399_v38 = vpop.f32.mrf.mxu0  ;;  %v8406_v11 = vpop.f32.mrf.mxu1 }
 0x1d9   : > { %v7113_v37 = vadd.f32 %v8399_v38, %v7030_v28 }
 0x1da   : > { %v7105_v43 = vpop.f32.mrf.mxu0  ;;  %v7187_v54 = vpop.f32.mrf.mxu1 }
 0x1db   : > { %v7196_v56 = vadd.f32 %v8406_v11, %v7113_v37  ;;  %v7106_v59 = vadd.f32 %v7105_v43, %v7024_v17 }
 0x1dd   : > { %v7188_v55 = vadd.f32 %v7187_v54, %v7106_v59  ;;  %v8413_v58 = vpop.f32.mrf.mxu0 }
 0x1de   : > { %v7279_v1 = vadd.f32 %v8413_v58, %v7196_v56  ;;  %v8420_v7 = vpop.f32.mrf.mxu1 }
 0x1df   : > { %v7272_v2 = vpop.f32.mrf.mxu0 }
 0x1e0   : > { %v7358_v51 = vadd.f32 %v8420_v7, %v7279_v1  ;;  %v7273_v47 = vadd.f32 %v7272_v2, %v7188_v55  ;;  %v7351_v4 = vpop.f32.mrf.mxu1 }
 0x1e2   : > { %v7362_v5 = vadd.f32 %v7358_v51, %v6847_v53  ;;  %v7352_v49 = vadd.f32 %v7351_v4, %v7273_v47 }
 0x1e4   : > { %v7489_v6 = vmul.f32 -1.442695, %v7362_v5  ;;  %v7361_v32 = vadd.f32 %v7352_v49, %v6846_v57 }
 0x1e6   : > { %8463 = vpow2.f32 %v7489_v6  ;;  %v7488_v3 = vmul.f32 -1.442695, %v7361_v32 }
 0x1e8   : > { %8465 = vpow2.f32 %v7488_v3 }
 0x1f3   : > { %v8464_v8 = vpop.eup %8463 }
 0x1f4   : > { %v7370_v52 = vadd.f32 1.0, %v8464_v8 }
 0x1f5   : > { %v8466_v12 = vpop.eup %8465 }
 0x1f6   : > { %8467 = vrcp.f32 %v7370_v52  ;;  %v7369_v14 = vadd.f32 1.0, %v8466_v12 }
 0x1f8   : > { %8469 = vrcp.f32 %v7369_v14 }
 0x203   : > { %v8468_v16 = vpop.eup %8467 }
 0x204   : > { %7376 = vst.msk [vmem:[%s136_s28 + $0x8] sm:$0xff] %vm147_vm1, %v8468_v16 }
 0x205   : > { %v8470_v62 = vpop.eup %8469 }
 0x206   : > { %7375 = vst.msk [vmem:[%s136_s28] sm:$0xff] %vm147_vm1, %v8470_v62 }
 0x207   : > { %8484 = shalt.err (!%p8481_p3)
}
 0x208   : > { %s8485_s14 = scalar_lea.hbm %s9704_s4, 256  ;;  %s8489_s21 = scalar_lea.hbm %s9752_s2, 512 }
 0x209   : > { %p8486_p4 = scmp.ne.s32.totalorder %s9704_s4, %s8485_s14  ;;  %p8490_p9 = scmp.lt.s32.totalorder %s9704_s4, %s9752_s2 }
 0x20a   : > { %p8491_p10 = scmp.lt.s32.totalorder %s8489_s21, %s8485_s14 }
 0x20b   : > { %p8487_p7 = pnand %p8486_p4, %p8590_p5 }
 0x20c   : > { %p8492_p11 = por %p8491_p10, %p8490_p9 }
 0x20d   : > { %p8488_p8 = pneg %p8487_p7 }
 0x20f   : > { %p8493_p12 = pnand %p8492_p11, %p8488_p8 }
 0x211   : > { %8496 = shalt.err (!%p8493_p12)
}
 0x212   : > { %s8535_s24 = smov 128   ;;  %s8536_s25 = smov 8  }
 0x213   : > { %8421 = dma.vmem_to_hbm [thread:$0]  (%p8590_p5), %s9706_s29, 256, %s9704_s4, %s9710_s5, %s8535_s24, %s8535_s24, %s8536_s25  }
 0x214 PF: > { %p8427_p13 = scmp.ge.s32.totalorder %s8531_s12, 2  ;;  %s7406_s26 = sand.u32 1, %s8519_s9  }
 0x215   : > { %s7407_s27 = scalar_lea.sflag [#allocation4], %s7406_s26 }
 0x216   : > { %p8424_p0 = pnand %p8427_p13, %p8594_p6 }
 0x218   : > { %p8425_p1 = pneg %p8424_p0 }
 0x21a   : > { %8514 = dma.done.wait (%p8425_p1), %s7407_s27, 256  }
 0x21b   : > { %8516 = vsyncadd (%p8425_p1), %s7407_s27, 4294967040  ;;  %p12_p2 = scmp.ge.s32.totalorder %s8577_s15, 4   ;;  %s9793_s9 = smov %s8523_s10 }
 0x21c   : > { %s9794_s10 = smov %s8527_s11  ;;  %s9795_s11 = smov %s8588_s18 }
 0x21d   : > { %s9796_s12 = smov %s8577_s15  ;;  %14 = sbr.rel (!%p12_p2) target bundleno = 3 (0x3), region = 78 }
 0x222   :  { %7412 = vsyncpa [#allocation4], 1 }
 0x223   :  { %7414 = vsyncpa [#allocation4 + $0x1], 1 }

</bundles_post_ra>
